<compile_context>
chip_gen: v6e
topology: v6e:2x2x1
jax: 0.10.0
libtpu: 0.0.40
codegen_flags: <defaults>
</compile_context>

<pallas_src>
import functools

import jax
import jax.numpy as jnp
from jax.experimental import pallas as pl
from jax.experimental.pallas import tpu as pltpu

INPUT_DIM = 32
HIDDEN_DIM = 128
NUM_BLOCKS = 5
BN_EPS = 1e-5


def _round_up(x, m):
    return ((x + m - 1) // m) * m


# ---------------------------------------------------------------------------
# Kernel
# ---------------------------------------------------------------------------
def _fraud_kernel(
    x_ref,
    w_in_ref, b_in_ref,
    bw1_ref, bb1_ref, bw2_ref, bb2_ref,
    aw1_ref, ab1_ref, aw2_ref, ab2_ref,
    ow1_ref, ob1_ref, ow2_ref, ob2_ref, ow3_ref, ob3_ref,
    out_ref,
    *, num_blocks,
):
    def mm(a, w):
        # bf16 (or f32) MXU matmul with f32 accumulation.
        return jnp.dot(a.astype(w.dtype), w, preferred_element_type=jnp.float32)

    x = x_ref[...]                                           # (TB, K_pad) f32

    # input_layer (+ folded BN) -> ReLU
    h = jnp.maximum(mm(x, w_in_ref[...]) + b_in_ref[...], 0.0)

    # residual blocks: Linear(+BN) -> ReLU -> (Dropout=id) -> Linear(+BN) -> +id -> ReLU
    for i in range(num_blocks):                              # static unroll (5)
        identity = h
        y = jnp.maximum(mm(h, bw1_ref[i]) + bb1_ref[i], 0.0)
        y = mm(y, bw2_ref[i]) + bb2_ref[i]
        h = jnp.maximum(y + identity, 0.0)

    # attention head: Linear -> ReLU -> Linear(->1) -> sigmoid, then gate h.
    # (VPU mul + XLU lane reduce; do NOT turn into an N=1 matmul)
    a = jnp.maximum(mm(h, aw1_ref[...]) + ab1_ref[...], 0.0)
    attn_logit = jnp.sum(a * aw2_ref[...], axis=-1, keepdims=True) + ab2_ref[...]
    h = h * jax.nn.sigmoid(attn_logit)

    # output head: Linear(+BN) -> ReLU -> Linear -> ReLU -> Linear(->1) -> sigmoid
    o = jnp.maximum(mm(h, ow1_ref[...]) + ob1_ref[...], 0.0)
    o = jnp.maximum(mm(o, ow2_ref[...]) + ob2_ref[...], 0.0)
    logit = jnp.sum(o * ow3_ref[...], axis=-1, keepdims=True) + ob3_ref[...]
    out_ref[...] = jax.nn.sigmoid(logit)


# ---------------------------------------------------------------------------
# Wrapper
# ---------------------------------------------------------------------------
def residual_fraud_net_forward(x, params, *, tile_b=256, num_blocks=NUM_BLOCKS):
    batch, in_dim = x.shape
    k_pad, _ = params["w_in"].shape

    # Batch tile: multiple of 8 (sublane), no larger than the (8-padded) batch.
    tile_b = _round_up(max(8, min(tile_b, _round_up(batch, 8))), 8)
    b_pad = _round_up(batch, tile_b)
    num_tiles = b_pad // tile_b

    # Pad batch to a whole number of tiles and features to the 128-lane K.
    # Padded rows/cols are zeros; their (finite) outputs are sliced off below.
    x = x.astype(jnp.float32)
    if b_pad != batch or k_pad != in_dim:
        x_p = jnp.zeros((b_pad, k_pad), jnp.float32).at[:batch, :in_dim].set(x)
    else:
        x_p = x

    weight_args = (
        params["w_in"], params["b_in"],
        params["blk_w1"], params["blk_b1"], params["blk_w2"], params["blk_b2"],
        params["attn_w1"], params["attn_b1"], params["attn_w2"], params["attn_b2"],
        params["out_w1"], params["out_b1"], params["out_w2"], params["out_b2"],
        params["out_w3"], params["out_b3"],
    )

    def resident(arr):
        # Full-array block + constant index_map => weight DMA'd once, stays in VMEM.
        zeros = (0,) * arr.ndim
        return pl.BlockSpec(arr.shape, lambda i, z=zeros: z)

    in_specs = [pl.BlockSpec((tile_b, k_pad), lambda i: (i, 0))]
    in_specs += [resident(a) for a in weight_args]
    out_spec = pl.BlockSpec((tile_b, 1), lambda i: (i, 0))

    kernel = functools.partial(_fraud_kernel, num_blocks=num_blocks)
    out = pl.pallas_call(
        kernel,
        grid=(num_tiles,),
        in_specs=in_specs,
        out_specs=out_spec,
        out_shape=jax.ShapeDtypeStruct((b_pad, 1), jnp.float32),
        compiler_params=pltpu.CompilerParams(
            dimension_semantics=("parallel",)),   # shard batch tiles across TCs (v7x)
    )(x_p, *weight_args)
    return out[:batch]


# ---------------------------------------------------------------------------
# Parameters (deterministic synthetic init, pre-folded for the kernel)
# ---------------------------------------------------------------------------
def init_params(key, input_dim=INPUT_DIM, hidden=HIDDEN_DIM,
                num_blocks=NUM_BLOCKS, weight_dtype=jnp.bfloat16):
    """Linear weights stored [in, out] (transposed vs. torch).  Eval-mode BN
    (gamma, beta, running mean/var) is folded into the preceding Linear:
      scale = gamma / sqrt(var + eps); shift = beta - mean * scale
      W' = W * scale;  b' = b * scale + shift        (exact reformulation)
    Weights are cast to `weight_dtype` (bf16 by default); biases stay f32."""
    h2, h4 = hidden // 2, hidden // 4
    keys = iter(jax.random.split(key, 64))

    def lin(k, fi, fo):
        bound = 1.0 / (fi ** 0.5)
        kw, kb = jax.random.split(k)
        w = jax.random.uniform(kw, (fi, fo), jnp.float32, -bound, bound)
        b = jax.random.uniform(kb, (1, fo), jnp.float32, -bound, bound)
        return w, b

    def bn(k, feat):
        kg, kb2, km, kv = jax.random.split(k, 4)
        gamma = 1.0 + 0.1 * jax.random.normal(kg, (feat,), jnp.float32)
        beta = 0.1 * jax.random.normal(kb2, (feat,), jnp.float32)
        mean = 0.1 * jax.random.normal(km, (feat,), jnp.float32)
        var = 1.0 + 0.1 * jax.random.uniform(kv, (feat,), jnp.float32)
        return gamma, beta, mean, var

    def fold(w, b, stats):
        gamma, beta, mean, var = stats
        scale = gamma / jnp.sqrt(var + BN_EPS)
        shift = beta - mean * scale
        return w * scale[None, :], b * scale[None, :] + shift[None, :]

    wdt = weight_dtype
    p = {}

    # input layer + BN folded; pad contraction dim (K) to 128 lanes with zeros.
    w_in, b_in = fold(*lin(next(keys), input_dim, hidden), bn(next(keys), hidden))
    k_pad = _round_up(input_dim, 128)
    w_in_p = jnp.zeros((k_pad, hidden), jnp.float32).at[:input_dim].set(w_in)
    p["w_in"], p["b_in"] = w_in_p.astype(wdt), b_in

    bw1, bb1, bw2, bb2 = [], [], [], []
    for _ in range(num_blocks):
        w1, b1 = fold(*lin(next(keys), hidden, hidden), bn(next(keys), hidden))
        w2, b2 = fold(*lin(next(keys), hidden, hidden), bn(next(keys), hidden))
        bw1.append(w1); bb1.append(b1); bw2.append(w2); bb2.append(b2)
    p["blk_w1"] = jnp.stack(bw1).astype(wdt)   # [NB, H, H]
    p["blk_b1"] = jnp.stack(bb1)               # [NB, 1, H] f32
    p["blk_w2"] = jnp.stack(bw2).astype(wdt)
    p["blk_b2"] = jnp.stack(bb2)

    aw1, ab1 = lin(next(keys), hidden, h2)
    aw2, ab2 = lin(next(keys), h2, 1)
    p["attn_w1"], p["attn_b1"] = aw1.astype(wdt), ab1
    p["attn_w2"], p["attn_b2"] = aw2.T, ab2            # [1, H/2] f32 (VPU head)

    ow1, ob1 = fold(*lin(next(keys), hidden, h2), bn(next(keys), h2))
    ow2, ob2 = lin(next(keys), h2, h4)
    ow3, ob3 = lin(next(keys), h4, 1)
    p["out_w1"], p["out_b1"] = ow1.astype(wdt), ob1
    p["out_w2"], p["out_b2"] = ow2.astype(wdt), ob2
    p["out_w3"], p["out_b3"] = ow3.T, ob3              # [1, H/4] f32 (VPU head)
    return p


# ---------------------------------------------------------------------------
# Pure-JAX reference (identical math) for a sanity check
# ---------------------------------------------------------------------------
def reference_forward(x, params, num_blocks=NUM_BLOCKS):
    def mm(a, w):
        return jnp.dot(a.astype(w.dtype), w, preferred_element_type=jnp.float32)

    k_pad = params["w_in"].shape[0]
    xp = jnp.zeros((x.shape[0], k_pad), jnp.float32).at[:, : x.shape[1]].set(x)
    h = jnp.maximum(mm(xp, params["w_in"]) + params["b_in"], 0.0)
    for i in range(num_blocks):
        idn = h
        y = jnp.maximum(mm(h, params["blk_w1"][i]) + params["blk_b1"][i], 0.0)
        y = mm(y, params["blk_w2"][i]) + params["blk_b2"][i]
        h = jnp.maximum(y + idn, 0.0)
    a = jnp.maximum(mm(h, params["attn_w1"]) + params["attn_b1"], 0.0)
    attn = jax.nn.sigmoid(
        jnp.sum(a * params["attn_w2"], -1, keepdims=True) + params["attn_b2"])
    h = h * attn
    o = jnp.maximum(mm(h, params["out_w1"]) + params["out_b1"], 0.0)
    o = jnp.maximum(mm(o, params["out_w2"]) + params["out_b2"], 0.0)
    return jax.nn.sigmoid(
        jnp.sum(o * params["out_w3"], -1, keepdims=True) + params["out_b3"])


if __name__ == "__main__":
    key = jax.random.PRNGKey(0)
    k_x, k_p = jax.random.split(key)

    batch = 50  # small demo; with tile_b=32 this pads to 64 rows -> a 2-step grid
    x = jax.random.normal(k_x, (batch, INPUT_DIM), jnp.float32)
    params = init_params(k_p)

    out = residual_fraud_net_forward(x, params, tile_b=32)
    out = jax.block_until_ready(out)

    ref = reference_forward(x, params)
    assert out.shape == (batch, 1), out.shape
    assert bool(jnp.all(jnp.isfinite(out)))
    assert jnp.allclose(out, ref, atol=1e-3, rtol=1e-3), \
        float(jnp.max(jnp.abs(out - ref)))
    print("KERNEL_OK")
</pallas_src>

<mosaic_0001>
module attributes {stable_mosaic.version = 11 : i64} {
  func.func @_fraud_kernel(%arg0: i32, %arg1: memref<32x128xf32, #tpu.memory_space<vmem>>, %arg2: memref<128x128xbf16, #tpu.memory_space<vmem>>, %arg3: memref<1x128xf32, #tpu.memory_space<vmem>>, %arg4: memref<5x128x128xbf16, #tpu.memory_space<vmem>>, %arg5: memref<5x1x128xf32, #tpu.memory_space<vmem>>, %arg6: memref<5x128x128xbf16, #tpu.memory_space<vmem>>, %arg7: memref<5x1x128xf32, #tpu.memory_space<vmem>>, %arg8: memref<128x64xbf16, #tpu.memory_space<vmem>>, %arg9: memref<1x64xf32, #tpu.memory_space<vmem>>, %arg10: memref<1x64xf32, #tpu.memory_space<vmem>>, %arg11: memref<1x1xf32, #tpu.memory_space<vmem>>, %arg12: memref<128x64xbf16, #tpu.memory_space<vmem>>, %arg13: memref<1x64xf32, #tpu.memory_space<vmem>>, %arg14: memref<64x32xbf16, #tpu.memory_space<vmem>>, %arg15: memref<1x32xf32, #tpu.memory_space<vmem>>, %arg16: memref<1x32xf32, #tpu.memory_space<vmem>>, %arg17: memref<1x1xf32, #tpu.memory_space<vmem>>, %arg18: memref<32x1xf32, #tpu.memory_space<vmem>>) attributes {dimension_semantics = [#tpu.dimension_semantics<parallel>], iteration_bounds = array<i64: 2>, scalar_prefetch = 0 : i64, scratch_operands = 0 : i64, tpu.core_type = #tpu.core_type<tc>, window_params = [{transform_indices = @transform_0, window_bounds = array<i64: 32, 128>}, {pipeline_mode = #tpu.pipeline_mode<synchronous>, transform_indices = @transform_1, window_bounds = array<i64: 128, 128>}, {pipeline_mode = #tpu.pipeline_mode<synchronous>, transform_indices = @transform_2, window_bounds = array<i64: 1, 128>}, {pipeline_mode = #tpu.pipeline_mode<synchronous>, transform_indices = @transform_3, window_bounds = array<i64: 5, 128, 128>}, {pipeline_mode = #tpu.pipeline_mode<synchronous>, transform_indices = @transform_4, window_bounds = array<i64: 5, 1, 128>}, {pipeline_mode = #tpu.pipeline_mode<synchronous>, transform_indices = @transform_5, window_bounds = array<i64: 5, 128, 128>}, {pipeline_mode = #tpu.pipeline_mode<synchronous>, transform_indices = @transform_6, window_bounds = array<i64: 5, 1, 128>}, {pipeline_mode = #tpu.pipeline_mode<synchronous>, transform_indices = @transform_7, window_bounds = array<i64: 128, 64>}, {pipeline_mode = #tpu.pipeline_mode<synchronous>, transform_indices = @transform_8, window_bounds = array<i64: 1, 64>}, {pipeline_mode = #tpu.pipeline_mode<synchronous>, transform_indices = @transform_9, window_bounds = array<i64: 1, 64>}, {pipeline_mode = #tpu.pipeline_mode<synchronous>, transform_indices = @transform_10, window_bounds = array<i64: 1, 1>}, {pipeline_mode = #tpu.pipeline_mode<synchronous>, transform_indices = @transform_11, window_bounds = array<i64: 128, 64>}, {pipeline_mode = #tpu.pipeline_mode<synchronous>, transform_indices = @transform_12, window_bounds = array<i64: 1, 64>}, {pipeline_mode = #tpu.pipeline_mode<synchronous>, transform_indices = @transform_13, window_bounds = array<i64: 64, 32>}, {pipeline_mode = #tpu.pipeline_mode<synchronous>, transform_indices = @transform_14, window_bounds = array<i64: 1, 32>}, {pipeline_mode = #tpu.pipeline_mode<synchronous>, transform_indices = @transform_15, window_bounds = array<i64: 1, 32>}, {pipeline_mode = #tpu.pipeline_mode<synchronous>, transform_indices = @transform_16, window_bounds = array<i64: 1, 1>}, {transform_indices = @transform_17, window_bounds = array<i64: 32, 1>}]} {
    %c0 = arith.constant 0 : index
    %c0_0 = arith.constant 0 : index
    %0 = vector.load %arg1[%c0, %c0_0] : memref<32x128xf32, #tpu.memory_space<vmem>>, vector<32x128xf32>
    %c0_1 = arith.constant 0 : index
    %c0_2 = arith.constant 0 : index
    %1 = vector.load %arg2[%c0_1, %c0_2] : memref<128x128xbf16, #tpu.memory_space<vmem>>, vector<128x128xbf16>
    %2 = arith.truncf %0 : vector<32x128xf32> to vector<32x128xbf16>
    %cst = arith.constant dense<0.000000e+00> : vector<32x128xf32>
    %3 = tpu.matmul %2, %1, %cst {dimension_numbers = #tpu.dot_dimension_numbers<[1], [0], [0], [1], [0, 0, 1, 1], [], []>} : vector<32x128xbf16>, vector<128x128xbf16>, vector<32x128xf32> -> vector<32x128xf32>
    %c0_3 = arith.constant 0 : index
    %c0_4 = arith.constant 0 : index
    %4 = vector.load %arg3[%c0_3, %c0_4] : memref<1x128xf32, #tpu.memory_space<vmem>>, vector<1x128xf32>
    %5 = vector.broadcast %4 : vector<1x128xf32> to vector<32x128xf32>
    %6 = arith.addf %3, %5 : vector<32x128xf32>
    %cst_5 = arith.constant 0.000000e+00 : f32
    %7 = vector.broadcast %cst_5 : f32 to vector<32x128xf32>
    %8 = arith.maximumf %6, %7 : vector<32x128xf32>
    %c0_6 = arith.constant 0 : index
    %c0_7 = arith.constant 0 : index
    %c0_8 = arith.constant 0 : index
    %9 = vector.load %arg4[%c0_6, %c0_7, %c0_8] : memref<5x128x128xbf16, #tpu.memory_space<vmem>>, vector<1x128x128xbf16>
    %10 = vector.shape_cast %9 : vector<1x128x128xbf16> to vector<128x128xbf16>
    %11 = arith.truncf %8 : vector<32x128xf32> to vector<32x128xbf16>
    %cst_9 = arith.constant dense<0.000000e+00> : vector<32x128xf32>
    %12 = tpu.matmul %11, %10, %cst_9 {dimension_numbers = #tpu.dot_dimension_numbers<[1], [0], [0], [1], [0, 0, 1, 1], [], []>} : vector<32x128xbf16>, vector<128x128xbf16>, vector<32x128xf32> -> vector<32x128xf32>
    %c0_10 = arith.constant 0 : index
    %c0_11 = arith.constant 0 : index
    %c0_12 = arith.constant 0 : index
    %13 = vector.load %arg5[%c0_10, %c0_11, %c0_12] : memref<5x1x128xf32, #tpu.memory_space<vmem>>, vector<1x1x128xf32>
    %14 = vector.shape_cast %13 : vector<1x1x128xf32> to vector<1x128xf32>
    %15 = vector.broadcast %14 : vector<1x128xf32> to vector<32x128xf32>
    %16 = arith.addf %12, %15 : vector<32x128xf32>
    %cst_13 = arith.constant 0.000000e+00 : f32
    %17 = vector.broadcast %cst_13 : f32 to vector<32x128xf32>
    %18 = arith.maximumf %16, %17 : vector<32x128xf32>
    %c0_14 = arith.constant 0 : index
    %c0_15 = arith.constant 0 : index
    %c0_16 = arith.constant 0 : index
    %19 = vector.load %arg6[%c0_14, %c0_15, %c0_16] : memref<5x128x128xbf16, #tpu.memory_space<vmem>>, vector<1x128x128xbf16>
    %20 = vector.shape_cast %19 : vector<1x128x128xbf16> to vector<128x128xbf16>
    %21 = arith.truncf %18 : vector<32x128xf32> to vector<32x128xbf16>
    %cst_17 = arith.constant dense<0.000000e+00> : vector<32x128xf32>
    %22 = tpu.matmul %21, %20, %cst_17 {dimension_numbers = #tpu.dot_dimension_numbers<[1], [0], [0], [1], [0, 0, 1, 1], [], []>} : vector<32x128xbf16>, vector<128x128xbf16>, vector<32x128xf32> -> vector<32x128xf32>
    %c0_18 = arith.constant 0 : index
    %c0_19 = arith.constant 0 : index
    %c0_20 = arith.constant 0 : index
    %23 = vector.load %arg7[%c0_18, %c0_19, %c0_20] : memref<5x1x128xf32, #tpu.memory_space<vmem>>, vector<1x1x128xf32>
    %24 = vector.shape_cast %23 : vector<1x1x128xf32> to vector<1x128xf32>
    %25 = vector.broadcast %24 : vector<1x128xf32> to vector<32x128xf32>
    %26 = arith.addf %22, %25 : vector<32x128xf32>
    %27 = arith.addf %26, %8 : vector<32x128xf32>
    %cst_21 = arith.constant 0.000000e+00 : f32
    %28 = vector.broadcast %cst_21 : f32 to vector<32x128xf32>
    %29 = arith.maximumf %27, %28 : vector<32x128xf32>
    %c1 = arith.constant 1 : index
    %c0_22 = arith.constant 0 : index
    %c0_23 = arith.constant 0 : index
    %30 = vector.load %arg4[%c1, %c0_22, %c0_23] : memref<5x128x128xbf16, #tpu.memory_space<vmem>>, vector<1x128x128xbf16>
    %31 = vector.shape_cast %30 : vector<1x128x128xbf16> to vector<128x128xbf16>
    %32 = arith.truncf %29 : vector<32x128xf32> to vector<32x128xbf16>
    %cst_24 = arith.constant dense<0.000000e+00> : vector<32x128xf32>
    %33 = tpu.matmul %32, %31, %cst_24 {dimension_numbers = #tpu.dot_dimension_numbers<[1], [0], [0], [1], [0, 0, 1, 1], [], []>} : vector<32x128xbf16>, vector<128x128xbf16>, vector<32x128xf32> -> vector<32x128xf32>
    %c1_25 = arith.constant 1 : index
    %c0_26 = arith.constant 0 : index
    %c0_27 = arith.constant 0 : index
    %34 = vector.load %arg5[%c1_25, %c0_26, %c0_27] : memref<5x1x128xf32, #tpu.memory_space<vmem>>, vector<1x1x128xf32>
    %35 = vector.shape_cast %34 : vector<1x1x128xf32> to vector<1x128xf32>
    %36 = vector.broadcast %35 : vector<1x128xf32> to vector<32x128xf32>
    %37 = arith.addf %33, %36 : vector<32x128xf32>
    %cst_28 = arith.constant 0.000000e+00 : f32
    %38 = vector.broadcast %cst_28 : f32 to vector<32x128xf32>
    %39 = arith.maximumf %37, %38 : vector<32x128xf32>
    %c1_29 = arith.constant 1 : index
    %c0_30 = arith.constant 0 : index
    %c0_31 = arith.constant 0 : index
    %40 = vector.load %arg6[%c1_29, %c0_30, %c0_31] : memref<5x128x128xbf16, #tpu.memory_space<vmem>>, vector<1x128x128xbf16>
    %41 = vector.shape_cast %40 : vector<1x128x128xbf16> to vector<128x128xbf16>
    %42 = arith.truncf %39 : vector<32x128xf32> to vector<32x128xbf16>
    %cst_32 = arith.constant dense<0.000000e+00> : vector<32x128xf32>
    %43 = tpu.matmul %42, %41, %cst_32 {dimension_numbers = #tpu.dot_dimension_numbers<[1], [0], [0], [1], [0, 0, 1, 1], [], []>} : vector<32x128xbf16>, vector<128x128xbf16>, vector<32x128xf32> -> vector<32x128xf32>
    %c1_33 = arith.constant 1 : index
    %c0_34 = arith.constant 0 : index
    %c0_35 = arith.constant 0 : index
    %44 = vector.load %arg7[%c1_33, %c0_34, %c0_35] : memref<5x1x128xf32, #tpu.memory_space<vmem>>, vector<1x1x128xf32>
    %45 = vector.shape_cast %44 : vector<1x1x128xf32> to vector<1x128xf32>
    %46 = vector.broadcast %45 : vector<1x128xf32> to vector<32x128xf32>
    %47 = arith.addf %43, %46 : vector<32x128xf32>
    %48 = arith.addf %47, %29 : vector<32x128xf32>
    %cst_36 = arith.constant 0.000000e+00 : f32
    %49 = vector.broadcast %cst_36 : f32 to vector<32x128xf32>
    %50 = arith.maximumf %48, %49 : vector<32x128xf32>
    %c2 = arith.constant 2 : index
    %c0_37 = arith.constant 0 : index
    %c0_38 = arith.constant 0 : index
    %51 = vector.load %arg4[%c2, %c0_37, %c0_38] : memref<5x128x128xbf16, #tpu.memory_space<vmem>>, vector<1x128x128xbf16>
    %52 = vector.shape_cast %51 : vector<1x128x128xbf16> to vector<128x128xbf16>
    %53 = arith.truncf %50 : vector<32x128xf32> to vector<32x128xbf16>
    %cst_39 = arith.constant dense<0.000000e+00> : vector<32x128xf32>
    %54 = tpu.matmul %53, %52, %cst_39 {dimension_numbers = #tpu.dot_dimension_numbers<[1], [0], [0], [1], [0, 0, 1, 1], [], []>} : vector<32x128xbf16>, vector<128x128xbf16>, vector<32x128xf32> -> vector<32x128xf32>
    %c2_40 = arith.constant 2 : index
    %c0_41 = arith.constant 0 : index
    %c0_42 = arith.constant 0 : index
    %55 = vector.load %arg5[%c2_40, %c0_41, %c0_42] : memref<5x1x128xf32, #tpu.memory_space<vmem>>, vector<1x1x128xf32>
    %56 = vector.shape_cast %55 : vector<1x1x128xf32> to vector<1x128xf32>
    %57 = vector.broadcast %56 : vector<1x128xf32> to vector<32x128xf32>
    %58 = arith.addf %54, %57 : vector<32x128xf32>
    %cst_43 = arith.constant 0.000000e+00 : f32
    %59 = vector.broadcast %cst_43 : f32 to vector<32x128xf32>
    %60 = arith.maximumf %58, %59 : vector<32x128xf32>
    %c2_44 = arith.constant 2 : index
    %c0_45 = arith.constant 0 : index
    %c0_46 = arith.constant 0 : index
    %61 = vector.load %arg6[%c2_44, %c0_45, %c0_46] : memref<5x128x128xbf16, #tpu.memory_space<vmem>>, vector<1x128x128xbf16>
    %62 = vector.shape_cast %61 : vector<1x128x128xbf16> to vector<128x128xbf16>
    %63 = arith.truncf %60 : vector<32x128xf32> to vector<32x128xbf16>
    %cst_47 = arith.constant dense<0.000000e+00> : vector<32x128xf32>
    %64 = tpu.matmul %63, %62, %cst_47 {dimension_numbers = #tpu.dot_dimension_numbers<[1], [0], [0], [1], [0, 0, 1, 1], [], []>} : vector<32x128xbf16>, vector<128x128xbf16>, vector<32x128xf32> -> vector<32x128xf32>
    %c2_48 = arith.constant 2 : index
    %c0_49 = arith.constant 0 : index
    %c0_50 = arith.constant 0 : index
    %65 = vector.load %arg7[%c2_48, %c0_49, %c0_50] : memref<5x1x128xf32, #tpu.memory_space<vmem>>, vector<1x1x128xf32>
    %66 = vector.shape_cast %65 : vector<1x1x128xf32> to vector<1x128xf32>
    %67 = vector.broadcast %66 : vector<1x128xf32> to vector<32x128xf32>
    %68 = arith.addf %64, %67 : vector<32x128xf32>
    %69 = arith.addf %68, %50 : vector<32x128xf32>
    %cst_51 = arith.constant 0.000000e+00 : f32
    %70 = vector.broadcast %cst_51 : f32 to vector<32x128xf32>
    %71 = arith.maximumf %69, %70 : vector<32x128xf32>
    %c3 = arith.constant 3 : index
    %c0_52 = arith.constant 0 : index
    %c0_53 = arith.constant 0 : index
    %72 = vector.load %arg4[%c3, %c0_52, %c0_53] : memref<5x128x128xbf16, #tpu.memory_space<vmem>>, vector<1x128x128xbf16>
    %73 = vector.shape_cast %72 : vector<1x128x128xbf16> to vector<128x128xbf16>
    %74 = arith.truncf %71 : vector<32x128xf32> to vector<32x128xbf16>
    %cst_54 = arith.constant dense<0.000000e+00> : vector<32x128xf32>
    %75 = tpu.matmul %74, %73, %cst_54 {dimension_numbers = #tpu.dot_dimension_numbers<[1], [0], [0], [1], [0, 0, 1, 1], [], []>} : vector<32x128xbf16>, vector<128x128xbf16>, vector<32x128xf32> -> vector<32x128xf32>
    %c3_55 = arith.constant 3 : index
    %c0_56 = arith.constant 0 : index
    %c0_57 = arith.constant 0 : index
    %76 = vector.load %arg5[%c3_55, %c0_56, %c0_57] : memref<5x1x128xf32, #tpu.memory_space<vmem>>, vector<1x1x128xf32>
    %77 = vector.shape_cast %76 : vector<1x1x128xf32> to vector<1x128xf32>
    %78 = vector.broadcast %77 : vector<1x128xf32> to vector<32x128xf32>
    %79 = arith.addf %75, %78 : vector<32x128xf32>
    %cst_58 = arith.constant 0.000000e+00 : f32
    %80 = vector.broadcast %cst_58 : f32 to vector<32x128xf32>
    %81 = arith.maximumf %79, %80 : vector<32x128xf32>
    %c3_59 = arith.constant 3 : index
    %c0_60 = arith.constant 0 : index
    %c0_61 = arith.constant 0 : index
    %82 = vector.load %arg6[%c3_59, %c0_60, %c0_61] : memref<5x128x128xbf16, #tpu.memory_space<vmem>>, vector<1x128x128xbf16>
    %83 = vector.shape_cast %82 : vector<1x128x128xbf16> to vector<128x128xbf16>
    %84 = arith.truncf %81 : vector<32x128xf32> to vector<32x128xbf16>
    %cst_62 = arith.constant dense<0.000000e+00> : vector<32x128xf32>
    %85 = tpu.matmul %84, %83, %cst_62 {dimension_numbers = #tpu.dot_dimension_numbers<[1], [0], [0], [1], [0, 0, 1, 1], [], []>} : vector<32x128xbf16>, vector<128x128xbf16>, vector<32x128xf32> -> vector<32x128xf32>
    %c3_63 = arith.constant 3 : index
    %c0_64 = arith.constant 0 : index
    %c0_65 = arith.constant 0 : index
    %86 = vector.load %arg7[%c3_63, %c0_64, %c0_65] : memref<5x1x128xf32, #tpu.memory_space<vmem>>, vector<1x1x128xf32>
    %87 = vector.shape_cast %86 : vector<1x1x128xf32> to vector<1x128xf32>
    %88 = vector.broadcast %87 : vector<1x128xf32> to vector<32x128xf32>
    %89 = arith.addf %85, %88 : vector<32x128xf32>
    %90 = arith.addf %89, %71 : vector<32x128xf32>
    %cst_66 = arith.constant 0.000000e+00 : f32
    %91 = vector.broadcast %cst_66 : f32 to vector<32x128xf32>
    %92 = arith.maximumf %90, %91 : vector<32x128xf32>
    %c4 = arith.constant 4 : index
    %c0_67 = arith.constant 0 : index
    %c0_68 = arith.constant 0 : index
    %93 = vector.load %arg4[%c4, %c0_67, %c0_68] : memref<5x128x128xbf16, #tpu.memory_space<vmem>>, vector<1x128x128xbf16>
    %94 = vector.shape_cast %93 : vector<1x128x128xbf16> to vector<128x128xbf16>
    %95 = arith.truncf %92 : vector<32x128xf32> to vector<32x128xbf16>
    %cst_69 = arith.constant dense<0.000000e+00> : vector<32x128xf32>
    %96 = tpu.matmul %95, %94, %cst_69 {dimension_numbers = #tpu.dot_dimension_numbers<[1], [0], [0], [1], [0, 0, 1, 1], [], []>} : vector<32x128xbf16>, vector<128x128xbf16>, vector<32x128xf32> -> vector<32x128xf32>
    %c4_70 = arith.constant 4 : index
    %c0_71 = arith.constant 0 : index
    %c0_72 = arith.constant 0 : index
    %97 = vector.load %arg5[%c4_70, %c0_71, %c0_72] : memref<5x1x128xf32, #tpu.memory_space<vmem>>, vector<1x1x128xf32>
    %98 = vector.shape_cast %97 : vector<1x1x128xf32> to vector<1x128xf32>
    %99 = vector.broadcast %98 : vector<1x128xf32> to vector<32x128xf32>
    %100 = arith.addf %96, %99 : vector<32x128xf32>
    %cst_73 = arith.constant 0.000000e+00 : f32
    %101 = vector.broadcast %cst_73 : f32 to vector<32x128xf32>
    %102 = arith.maximumf %100, %101 : vector<32x128xf32>
    %c4_74 = arith.constant 4 : index
    %c0_75 = arith.constant 0 : index
    %c0_76 = arith.constant 0 : index
    %103 = vector.load %arg6[%c4_74, %c0_75, %c0_76] : memref<5x128x128xbf16, #tpu.memory_space<vmem>>, vector<1x128x128xbf16>
    %104 = vector.shape_cast %103 : vector<1x128x128xbf16> to vector<128x128xbf16>
    %105 = arith.truncf %102 : vector<32x128xf32> to vector<32x128xbf16>
    %cst_77 = arith.constant dense<0.000000e+00> : vector<32x128xf32>
    %106 = tpu.matmul %105, %104, %cst_77 {dimension_numbers = #tpu.dot_dimension_numbers<[1], [0], [0], [1], [0, 0, 1, 1], [], []>} : vector<32x128xbf16>, vector<128x128xbf16>, vector<32x128xf32> -> vector<32x128xf32>
    %c4_78 = arith.constant 4 : index
    %c0_79 = arith.constant 0 : index
    %c0_80 = arith.constant 0 : index
    %107 = vector.load %arg7[%c4_78, %c0_79, %c0_80] : memref<5x1x128xf32, #tpu.memory_space<vmem>>, vector<1x1x128xf32>
    %108 = vector.shape_cast %107 : vector<1x1x128xf32> to vector<1x128xf32>
    %109 = vector.broadcast %108 : vector<1x128xf32> to vector<32x128xf32>
    %110 = arith.addf %106, %109 : vector<32x128xf32>
    %111 = arith.addf %110, %92 : vector<32x128xf32>
    %cst_81 = arith.constant 0.000000e+00 : f32
    %112 = vector.broadcast %cst_81 : f32 to vector<32x128xf32>
    %113 = arith.maximumf %111, %112 : vector<32x128xf32>
    %c0_82 = arith.constant 0 : index
    %c0_83 = arith.constant 0 : index
    %114 = vector.load %arg8[%c0_82, %c0_83] : memref<128x64xbf16, #tpu.memory_space<vmem>>, vector<128x64xbf16>
    %115 = arith.truncf %113 : vector<32x128xf32> to vector<32x128xbf16>
    %cst_84 = arith.constant dense<0.000000e+00> : vector<32x64xf32>
    %116 = tpu.matmul %115, %114, %cst_84 {dimension_numbers = #tpu.dot_dimension_numbers<[1], [0], [0], [1], [0, 0, 1, 1], [], []>} : vector<32x128xbf16>, vector<128x64xbf16>, vector<32x64xf32> -> vector<32x64xf32>
    %c0_85 = arith.constant 0 : index
    %c0_86 = arith.constant 0 : index
    %117 = vector.load %arg9[%c0_85, %c0_86] : memref<1x64xf32, #tpu.memory_space<vmem>>, vector<1x64xf32>
    %118 = vector.broadcast %117 : vector<1x64xf32> to vector<32x64xf32>
    %119 = arith.addf %116, %118 : vector<32x64xf32>
    %cst_87 = arith.constant 0.000000e+00 : f32
    %120 = vector.broadcast %cst_87 : f32 to vector<32x64xf32>
    %121 = arith.maximumf %119, %120 : vector<32x64xf32>
    %c0_88 = arith.constant 0 : index
    %c0_89 = arith.constant 0 : index
    %122 = vector.load %arg10[%c0_88, %c0_89] : memref<1x64xf32, #tpu.memory_space<vmem>>, vector<1x64xf32>
    %123 = vector.broadcast %122 : vector<1x64xf32> to vector<32x64xf32>
    %124 = arith.mulf %121, %123 : vector<32x64xf32>
    %cst_90 = arith.constant dense<0.000000e+00> : vector<32xf32>
    %125 = vector.multi_reduction <add>, %124, %cst_90 [1] : vector<32x64xf32> to vector<32xf32>
    %126 = vector.shape_cast %125 : vector<32xf32> to vector<32x1xf32>
    %c0_91 = arith.constant 0 : index
    %c0_92 = arith.constant 0 : index
    %127 = vector.load %arg11[%c0_91, %c0_92] : memref<1x1xf32, #tpu.memory_space<vmem>>, vector<1x1xf32>
    %128 = vector.broadcast %127 : vector<1x1xf32> to vector<32x1xf32>
    %129 = arith.addf %126, %128 : vector<32x1xf32>
    %130 = arith.negf %129 : vector<32x1xf32>
    %131 = math.exp %130 : vector<32x1xf32>
    %cst_93 = arith.constant 1.000000e+00 : f32
    %132 = vector.broadcast %cst_93 : f32 to vector<32x1xf32>
    %133 = arith.addf %132, %131 : vector<32x1xf32>
    %134 = arith.divf %132, %133 : vector<32x1xf32>
    %135 = vector.broadcast %134 : vector<32x1xf32> to vector<32x128xf32>
    %136 = arith.mulf %113, %135 : vector<32x128xf32>
    %c0_94 = arith.constant 0 : index
    %c0_95 = arith.constant 0 : index
    %137 = vector.load %arg12[%c0_94, %c0_95] : memref<128x64xbf16, #tpu.memory_space<vmem>>, vector<128x64xbf16>
    %138 = arith.truncf %136 : vector<32x128xf32> to vector<32x128xbf16>
    %cst_96 = arith.constant dense<0.000000e+00> : vector<32x64xf32>
    %139 = tpu.matmul %138, %137, %cst_96 {dimension_numbers = #tpu.dot_dimension_numbers<[1], [0], [0], [1], [0, 0, 1, 1], [], []>} : vector<32x128xbf16>, vector<128x64xbf16>, vector<32x64xf32> -> vector<32x64xf32>
    %c0_97 = arith.constant 0 : index
    %c0_98 = arith.constant 0 : index
    %140 = vector.load %arg13[%c0_97, %c0_98] : memref<1x64xf32, #tpu.memory_space<vmem>>, vector<1x64xf32>
    %141 = vector.broadcast %140 : vector<1x64xf32> to vector<32x64xf32>
    %142 = arith.addf %139, %141 : vector<32x64xf32>
    %cst_99 = arith.constant 0.000000e+00 : f32
    %143 = vector.broadcast %cst_99 : f32 to vector<32x64xf32>
    %144 = arith.maximumf %142, %143 : vector<32x64xf32>
    %c0_100 = arith.constant 0 : index
    %c0_101 = arith.constant 0 : index
    %145 = vector.load %arg14[%c0_100, %c0_101] : memref<64x32xbf16, #tpu.memory_space<vmem>>, vector<64x32xbf16>
    %146 = arith.truncf %144 : vector<32x64xf32> to vector<32x64xbf16>
    %cst_102 = arith.constant dense<0.000000e+00> : vector<32x32xf32>
    %147 = tpu.matmul %146, %145, %cst_102 {dimension_numbers = #tpu.dot_dimension_numbers<[1], [0], [0], [1], [0, 0, 1, 1], [], []>} : vector<32x64xbf16>, vector<64x32xbf16>, vector<32x32xf32> -> vector<32x32xf32>
    %c0_103 = arith.constant 0 : index
    %c0_104 = arith.constant 0 : index
    %148 = vector.load %arg15[%c0_103, %c0_104] : memref<1x32xf32, #tpu.memory_space<vmem>>, vector<1x32xf32>
    %149 = vector.broadcast %148 : vector<1x32xf32> to vector<32x32xf32>
    %150 = arith.addf %147, %149 : vector<32x32xf32>
    %cst_105 = arith.constant 0.000000e+00 : f32
    %151 = vector.broadcast %cst_105 : f32 to vector<32x32xf32>
    %152 = arith.maximumf %150, %151 : vector<32x32xf32>
    %c0_106 = arith.constant 0 : index
    %c0_107 = arith.constant 0 : index
    %153 = vector.load %arg16[%c0_106, %c0_107] : memref<1x32xf32, #tpu.memory_space<vmem>>, vector<1x32xf32>
    %154 = vector.broadcast %153 : vector<1x32xf32> to vector<32x32xf32>
    %155 = arith.mulf %152, %154 : vector<32x32xf32>
    %cst_108 = arith.constant dense<0.000000e+00> : vector<32xf32>
    %156 = vector.multi_reduction <add>, %155, %cst_108 [1] : vector<32x32xf32> to vector<32xf32>
    %157 = vector.shape_cast %156 : vector<32xf32> to vector<32x1xf32>
    %c0_109 = arith.constant 0 : index
    %c0_110 = arith.constant 0 : index
    %158 = vector.load %arg17[%c0_109, %c0_110] : memref<1x1xf32, #tpu.memory_space<vmem>>, vector<1x1xf32>
    %159 = vector.broadcast %158 : vector<1x1xf32> to vector<32x1xf32>
    %160 = arith.addf %157, %159 : vector<32x1xf32>
    %161 = arith.negf %160 : vector<32x1xf32>
    %162 = math.exp %161 : vector<32x1xf32>
    %cst_111 = arith.constant 1.000000e+00 : f32
    %163 = vector.broadcast %cst_111 : f32 to vector<32x1xf32>
    %164 = arith.addf %163, %162 : vector<32x1xf32>
    %165 = arith.divf %163, %164 : vector<32x1xf32>
    %c0_112 = arith.constant 0 : index
    %c0_113 = arith.constant 0 : index
    %166 = vector.load %arg18[%c0_112, %c0_113] : memref<32x1xf32, #tpu.memory_space<vmem>>, vector<32x1xf32>
    tpu.vector_store %arg18[%c0_112, %c0_113], %165 {strides = array<i32>} : memref<32x1xf32, #tpu.memory_space<vmem>>, vector<32x1xf32>,
    return
  }
  func.func @transform_0(%arg0: i32) -> (i32, i32) {
    %c0_i32 = arith.constant 0 : i32
    %c0_i32_0 = arith.constant 0 : i32
    return %arg0, %c0_i32 : i32, i32
  }
  func.func @transform_1(%arg0: i32) -> (i32, i32) {
    %c0_i32 = arith.constant 0 : i32
    %c0_i32_0 = arith.constant 0 : i32
    %c0_i32_1 = arith.constant 0 : i32
    return %c0_i32, %c0_i32_0 : i32, i32
  }
  func.func @transform_2(%arg0: i32) -> (i32, i32) {
    %c0_i32 = arith.constant 0 : i32
    %c0_i32_0 = arith.constant 0 : i32
    %c0_i32_1 = arith.constant 0 : i32
    return %c0_i32, %c0_i32_0 : i32, i32
  }
  func.func @transform_3(%arg0: i32) -> (i32, i32, i32) {
    %c0_i32 = arith.constant 0 : i32
    %c0_i32_0 = arith.constant 0 : i32
    %c0_i32_1 = arith.constant 0 : i32
    %c0_i32_2 = arith.constant 0 : i32
    return %c0_i32, %c0_i32_0, %c0_i32_1 : i32, i32, i32
  }
  func.func @transform_4(%arg0: i32) -> (i32, i32, i32) {
    %c0_i32 = arith.constant 0 : i32
    %c0_i32_0 = arith.constant 0 : i32
    %c0_i32_1 = arith.constant 0 : i32
    %c0_i32_2 = arith.constant 0 : i32
    return %c0_i32, %c0_i32_0, %c0_i32_1 : i32, i32, i32
  }
  func.func @transform_5(%arg0: i32) -> (i32, i32, i32) {
    %c0_i32 = arith.constant 0 : i32
    %c0_i32_0 = arith.constant 0 : i32
    %c0_i32_1 = arith.constant 0 : i32
    %c0_i32_2 = arith.constant 0 : i32
    return %c0_i32, %c0_i32_0, %c0_i32_1 : i32, i32, i32
  }
  func.func @transform_6(%arg0: i32) -> (i32, i32, i32) {
    %c0_i32 = arith.constant 0 : i32
    %c0_i32_0 = arith.constant 0 : i32
    %c0_i32_1 = arith.constant 0 : i32
    %c0_i32_2 = arith.constant 0 : i32
    return %c0_i32, %c0_i32_0, %c0_i32_1 : i32, i32, i32
  }
  func.func @transform_7(%arg0: i32) -> (i32, i32) {
    %c0_i32 = arith.constant 0 : i32
    %c0_i32_0 = arith.constant 0 : i32
    %c0_i32_1 = arith.constant 0 : i32
    return %c0_i32, %c0_i32_0 : i32, i32
  }
  func.func @transform_8(%arg0: i32) -> (i32, i32) {
    %c0_i32 = arith.constant 0 : i32
    %c0_i32_0 = arith.constant 0 : i32
    %c0_i32_1 = arith.constant 0 : i32
    return %c0_i32, %c0_i32_0 : i32, i32
  }
  func.func @transform_9(%arg0: i32) -> (i32, i32) {
    %c0_i32 = arith.constant 0 : i32
    %c0_i32_0 = arith.constant 0 : i32
    %c0_i32_1 = arith.constant 0 : i32
    return %c0_i32, %c0_i32_0 : i32, i32
  }
  func.func @transform_10(%arg0: i32) -> (i32, i32) {
    %c0_i32 = arith.constant 0 : i32
    %c0_i32_0 = arith.constant 0 : i32
    %c0_i32_1 = arith.constant 0 : i32
    return %c0_i32, %c0_i32_0 : i32, i32
  }
  func.func @transform_11(%arg0: i32) -> (i32, i32) {
    %c0_i32 = arith.constant 0 : i32
    %c0_i32_0 = arith.constant 0 : i32
    %c0_i32_1 = arith.constant 0 : i32
    return %c0_i32, %c0_i32_0 : i32, i32
  }
  func.func @transform_12(%arg0: i32) -> (i32, i32) {
    %c0_i32 = arith.constant 0 : i32
    %c0_i32_0 = arith.constant 0 : i32
    %c0_i32_1 = arith.constant 0 : i32
    return %c0_i32, %c0_i32_0 : i32, i32
  }
  func.func @transform_13(%arg0: i32) -> (i32, i32) {
    %c0_i32 = arith.constant 0 : i32
    %c0_i32_0 = arith.constant 0 : i32
    %c0_i32_1 = arith.constant 0 : i32
    return %c0_i32, %c0_i32_0 : i32, i32
  }
  func.func @transform_14(%arg0: i32) -> (i32, i32) {
    %c0_i32 = arith.constant 0 : i32
    %c0_i32_0 = arith.constant 0 : i32
    %c0_i32_1 = arith.constant 0 : i32
    return %c0_i32, %c0_i32_0 : i32, i32
  }
  func.func @transform_15(%arg0: i32) -> (i32, i32) {
    %c0_i32 = arith.constant 0 : i32
    %c0_i32_0 = arith.constant 0 : i32
    %c0_i32_1 = arith.constant 0 : i32
    return %c0_i32, %c0_i32_0 : i32, i32
  }
  func.func @transform_16(%arg0: i32) -> (i32, i32) {
    %c0_i32 = arith.constant 0 : i32
    %c0_i32_0 = arith.constant 0 : i32
    %c0_i32_1 = arith.constant 0 : i32
    return %c0_i32, %c0_i32_0 : i32, i32
  }
  func.func @transform_17(%arg0: i32) -> (i32, i32) {
    %c0_i32 = arith.constant 0 : i32
    %c0_i32_0 = arith.constant 0 : i32
    return %arg0, %c0_i32 : i32, i32
  }
}

</mosaic_0001>

<bundles_post_ra>
// kernel: tpu_custom_call.1
= control target key start
LH: loop header
LB: loop body
LE: loop exit
PB: predicated region body
PF: predicated region fallthrough
CT: control target
= control target key end

     0   :  { %s3884_s0 = inlined_call_operand.vmem [shape: f32[64,128], index: 0, kind: input, shape index: {}]   ;;  %s3885_s1 = inlined_call_operand.vmem [shape: bf16[128,128], index: 1, kind: input, shape index: {}]   ;;  %s3886_s2 = inlined_call_operand.vmem [shape: f32[1,128], index: 2, kind: input, shape index: {}]   ;;  %s3887_s3 = inlined_call_operand.hbm [shape: bf16[5,128,128], index: 3, kind: input, shape index: {}]   ;;  %s3888_s4 = inlined_call_operand.vmem [shape: f32[5,1,128], index: 4, kind: input, shape index: {}]   ;;  %s3889_s5 = inlined_call_operand.hbm [shape: bf16[5,128,128], index: 5, kind: input, shape index: {}]   ;;  %s3890_s6 = inlined_call_operand.vmem [shape: f32[5,1,128], index: 6, kind: input, shape index: {}]   ;;  %s3891_s7 = inlined_call_operand.vmem [shape: bf16[128,64], index: 7, kind: input, shape index: {}]   ;;  %s3892_s8 = inlined_call_operand.vmem [shape: f32[1,64], index: 8, kind: input, shape index: {}]   ;;  %s3893_s9 = inlined_call_operand.vmem [shape: f32[1,64], index: 9, kind: input, shape index: {}]   ;;  %s3894_s10 = inlined_call_operand.<no memory space> [shape: f32[1,1], index: 10, kind: input, shape index: {}]   ;;  %s3895_s11 = inlined_call_operand.vmem [shape: bf16[128,64], index: 11, kind: input, shape index: {}]   ;;  %s3896_s12 = inlined_call_operand.vmem [shape: f32[1,64], index: 12, kind: input, shape index: {}]   ;;  %s3897_s13 = inlined_call_operand.vmem [shape: bf16[64,32], index: 13, kind: input, shape index: {}]   ;;  %s3898_s14 = inlined_call_operand.vmem [shape: f32[1,32], index: 14, kind: input, shape index: {}]   ;;  %s3899_s15 = inlined_call_operand.vmem [shape: f32[1,32], index: 15, kind: input, shape index: {}]   ;;  %s3900_s17 = inlined_call_operand.vmem [shape: f32[64,1], index: 17, kind: output, shape index: {}]   ;;  %s3901_s16 = inlined_call_operand.<no memory space> [shape: f32[1,1], index: 16, kind: input, shape index: {}]  }
   0x1   :  { %3903 = sst [smem:[#allocation10_spill]] %s3884_s0  ;;  %v22_v0 = vstv %s3894_s10  ;;  %v24_v1 = vstv %s3901_s16 }
   0x2   :  { %3904 = sst [smem:[#allocation11_spill]] %s3885_s1  ;;  %23 = vst [vmem:[#allocation2] sm:$0x1] %v22_v0  ;;  %25 = vst [vmem:[#allocation3] sm:$0x1] %v24_v1 }
   0x3   :  { %26 = vsyncpa [#allocation5], 0 }
   0x4   :  { %27 = vsyncpa [#allocation7], 0  ;;  %s3500_s28 = smov 0  }
   0x5 LB: > { %s2590_s10 = sadd.s32 4294967295, %s3397_s28   ;;  %p2592_p0 = scmp.ge.s32.totalorder %s3397_s28, 1  ;;  %s3397_s28 = sphi %s3500_s28, %s33_s28  }
   0x6   : > { %p426_p1 = scmp.lt.s32.totalorder %s3397_s28, 3  ;;  %s3399_s29 = smov [#allocation4]  }
   0x7   : > { %s444_s16 = sshll.u32 %s3399_s29, 4  ;;  %p3514_p3 = scmp.eq.s32.totalorder %s2590_s10, 0  ;;  %s445_s16 = int_to_ptr.vmem [resolvable:$true] %s444_s16 }
   0x8   : > { %p3508_p2 = pnand %p2592_p0, %p426_p1  ;;  %s3400_s18 = smov [#allocation6]  }
   0x9   : > { %s460_s19 = sshll.u32 %s3400_s18, 4  ;;  %s3342_s20 = scalar_lea.vmem %s445_s16, 5120  ;;  %s461_s19 = int_to_ptr.vmem [resolvable:$true] %s460_s19 }
   0xa   : > { %p3165_p4 = pneg %p3508_p2  ;;  %p3343_p7 = scmp.ne.s32.totalorder %s445_s16, %s3342_s20 }
   0xb   : > { %p3350_p10 = scmp.lt.s32.totalorder %s445_s16, %s445_s16  ;;  %p3351_p11 = scmp.lt.s32.totalorder %s3342_s20, %s3342_s20 }
   0xc   : > { %p3522_p5 = pnand %p3514_p3, %p3165_p4 }
   0xd   : > { %p3352_p12 = por %p3351_p11, %p3350_p10 }
   0xe   : > { %p3333_p6 = pneg %p3522_p5 }
  0x10   : > { %p3345_p8 = pnand %p3343_p7, %p3333_p6 }
  0x12   : > { %p3346_p9 = pneg %p3345_p8 }
  0x14   : > { %p3353_p13 = pnand %p3352_p12, %p3346_p9 }
  0x16   : > { %3356 = shalt.err (!%p3353_p13)
}
  0x17   : > { %s3401_s21 = smov 64   ;;  %s3402_s22 = smov 4  }
  0x18   : > { %3168 = dma.hbm_to_vmem [thread:$0]  (!%p3522_p5), %s3887_s3, 5120, %s445_s16, [#allocation5], %s3401_s21, %s3401_s21, %s3402_s22  }
  0x19   : > { %s3368_s25 = scalar_lea.vmem %s461_s19, 5120  ;;  %p3376_p7 = scmp.lt.s32.totalorder %s461_s19, %s461_s19 }
  0x1a   : > { %p3369_p0 = scmp.ne.s32.totalorder %s461_s19, %s3368_s25  ;;  %p3377_p8 = scmp.lt.s32.totalorder %s3368_s25, %s3368_s25 }
  0x1c   : > { %p3371_p1 = pnand %p3369_p0, %p3333_p6  ;;  %p3378_p10 = por %p3377_p8, %p3376_p7 }
  0x1e   : > { %p3372_p4 = pneg %p3371_p1 }
  0x20   : > { %p3379_p9 = pnand %p3378_p10, %p3372_p4 }
  0x22   : > { %3382 = shalt.err (!%p3379_p9)
}
  0x23   : > { %3171 = dma.hbm_to_vmem [thread:$0]  (!%p3522_p5), %s3889_s5, 5120, %s461_s19, [#allocation7], %s3401_s21, %s3401_s21, %s3402_s22  }
  0x24   : > { %518 = sbr.rel (%p3508_p2) target bundleno = 3458 (0xd82), region = 88 }
  0x29   : > { %3388 = dma.done.wait (%p3514_p3), [#allocation5], 5120  }
  0x2a   : > { %3390 = vsyncadd (%p3514_p3), [#allocation5], 4294962176 }
  0x2b   : > { %3392 = dma.done.wait (%p3514_p3), [#allocation7], 5120  }
  0x2c   : > { %3394 = vsyncadd (%p3514_p3), [#allocation7], 4294962176  ;;  %s2599_s29 = sshll.u32 %s2590_s10, 2  ;;  %s3908_s18 = sld [smem:[#allocation11_spill]]  ;;  %v3199_v9 = vld [vmem:[#allocation4 + $0x38] sm:$0xff]   ;;  %v3200_v10 = vld [vmem:[#allocation4 + $0x30] sm:$0xff]  }
  0x2d   : > { %p575_p6 = scmp.lt.s32.totalorder %s2599_s29, 7  ;;  %s3909_s23 = sld [smem:[#allocation10_spill]]  ;;  %2905 = vmatprep.subr.bf16.mxu1 %v3199_v9  ;;  %v3201_v13 = vld [vmem:[#allocation4 + $0x28] sm:$0xff]   ;;  %v3202_v14 = vld [vmem:[#allocation4 + $0x20] sm:$0xff]   ;;  %v3203_v16 = vld [vmem:[#allocation4 + $0x18] sm:$0xff]   ;;  %vm2150_vm0 = vcmask 523264  }
  0x2e   : > { %2906 = vmatpush3.bf16.msra.mxu1 %v3199_v9  ;;  %v3204_v21 = vld [vmem:[#allocation4 + $0x10] sm:$0xff]   ;;  %v3205_v22 = vld [vmem:[#allocation4 + $0x8] sm:$0xff]   ;;  %v3206_v23 = vld [vmem:[#allocation4] sm:$0xff]   ;;  %vm2459_vm1 = vcmask 261120   ;;  %vm2507_vm2 = vcmask 7168  }
  0x2f   : > { %s3911_s29 = smov (!%p575_p6, %s2599_s29), 7  ;;  %2907 = vmatprep.subr.bf16.mxu1 %v3200_v10  ;;  %v3207_v24 = vld [vmem:[#allocation6 + $0x38] sm:$0xff]   ;;  %v3208_v25 = vld [vmem:[#allocation6 + $0x30] sm:$0xff]   ;;  %v3209_v26 = vld [vmem:[#allocation6 + $0x28] sm:$0xff]  }
  0x30   : > { %s2600_s20 = sshll.u32 %s3911_s29, 3  ;;  %v3210_v27 = vld [vmem:[#allocation6 + $0x20] sm:$0xff]   ;;  %v3211_v28 = vld [vmem:[#allocation6 + $0x18] sm:$0xff]   ;;  %v3212_v44 = vld [vmem:[#allocation6 + $0x10] sm:$0xff]  }
  0x31   : > { %v2603_v31 = vld [vmem:[%s3886_s2] ss:$0 sm:$0xff]  ;;  %v3213_v45 = vld [vmem:[#allocation6 + $0x8] sm:$0xff]   ;;  %v3214_v46 = vld [vmem:[#allocation6] sm:$0xff]   ;;  %s584_s1 = scalar_lea.vmem %s3900_s17, %s2600_s20 }
  0x32   : > { %v3191_v2 = vld [vmem:[%s3908_s18 + $0x38] sm:$0xff]   ;;  %v3192_v3 = vld [vmem:[%s3908_s18 + $0x30] sm:$0xff]   ;;  %v3193_v4 = vld [vmem:[%s3908_s18 + $0x28] sm:$0xff]   ;;  %2908 = vmatpush3.bf16.msra.mxu1 %v3200_v10 }
  0x33   : > { %2885 = vmatprep.subr.bf16.mxu0 %v3191_v2  ;;  %s3573_s24 = scalar_lea.vmem %s3909_s23, %s2600_s20  ;;  %v3194_v5 = vld [vmem:[%s3908_s18 + $0x20] sm:$0xff]   ;;  %v3195_v11 = vld [vmem:[%s3908_s18 + $0x18] sm:$0xff]   ;;  %v3196_v12 = vld [vmem:[%s3908_s18 + $0x10] sm:$0xff]   ;;  %2909 = vmatprep.subr.bf16.mxu1 %v3201_v13 }
  0x34   : > { %2886 = vmatpush3.bf16.msra.mxu0 %v3191_v2  ;;  %v587_v6 = vld [vmem:[%s3573_s24] sm:$0xff]  ;;  %v588_v7 = vld [vmem:[%s3573_s24 + $0x8] sm:$0xff]  ;;  %v589_v18 = vld [vmem:[%s3573_s24 + $0x10] sm:$0xff] }
  0x35   : > { %2887 = vmatprep.subr.bf16.mxu0 %v3192_v3  ;;  %v607_v8 = vpack.c.bf16 %v588_v7, %v587_v6  ;;  %v3197_v15 = vld [vmem:[%s3908_s18 + $0x8] sm:$0xff]   ;;  %v3198_v17 = vld [vmem:[%s3908_s18] sm:$0xff]   ;;  %v590_v19 = vld [vmem:[%s3573_s24 + $0x18] sm:$0xff] }
  0x36   : > { %2910 = vmatpush3.bf16.msra.mxu1 %v3201_v13  ;;  %v608_v20 = vpack.c.bf16 %v590_v19, %v589_v18  ;;  %v3215_v47 = vld [vmem:[#allocation4 + $0x78] sm:$0xff]   ;;  %v3216_v48 = vld [vmem:[#allocation4 + $0x70] sm:$0xff]   ;;  %v3217_v49 = vld [vmem:[#allocation4 + $0x68] sm:$0xff]  }
  0x37   : > { %2901 = vmatprep.mubr.bf16.mxu0 %v607_v8  ;;  %2911 = vmatprep.subr.bf16.mxu1 %v3202_v14  ;;  %v3218_v50 = vld [vmem:[#allocation4 + $0x60] sm:$0xff]   ;;  %v2612_v53 = vld [vmem:[%s3888_s4] ss:$0 sm:$0xff]  ;;  %v3224_v7 = vld [vmem:[#allocation6 + $0x70] sm:$0xff]  }
  0x38   : > { %2888 = vmatpush3.bf16.msra.mxu0 %v3192_v3  ;;  %v3219_v2 = vld [vmem:[#allocation4 + $0x58] sm:$0xff]   ;;  %v3220_v3 = vld [vmem:[#allocation4 + $0x50] sm:$0xff]   ;;  %v3225_v8 = vld [vmem:[#allocation6 + $0x68] sm:$0xff]  }
  0x39   : > { %2889 = vmatprep.subr.bf16.mxu0 %v3193_v4  ;;  %v3223_v6 = vld [vmem:[#allocation6 + $0x78] sm:$0xff]   ;;  %v3226_v9 = vld [vmem:[#allocation6 + $0x60] sm:$0xff]  }
  0x3a   : > { %2912 = vmatpush3.bf16.msra.mxu1 %v3202_v14  ;;  %v3227_v10 = vld [vmem:[#allocation6 + $0x58] sm:$0xff]  }
  0x3b   : > { %2913 = vmatprep.subr.bf16.mxu1 %v3203_v16 }
  0x3c   : > { %2890 = vmatpush3.bf16.msra.mxu0 %v3193_v4  ;;  %v3221_v4 = vld [vmem:[#allocation4 + $0x48] sm:$0xff]  }
  0x3d   : > { %2891 = vmatprep.subr.bf16.mxu0 %v3194_v5 }
  0x3e   : > { %2914 = vmatpush3.bf16.msra.mxu1 %v3203_v16 }
  0x3f   : > { %2915 = vmatprep.subr.bf16.mxu1 %v3204_v21 }
  0x40   : > { %2892 = vmatpush3.bf16.msra.mxu0 %v3194_v5  ;;  %v3222_v5 = vld [vmem:[#allocation4 + $0x40] sm:$0xff]  }
  0x41   : > { %2893 = vmatprep.subr.bf16.mxu0 %v3195_v11 }
  0x42   : > { %2916 = vmatpush3.bf16.msra.mxu1 %v3204_v21 }
  0x43   : > { %2917 = vmatprep.subr.bf16.mxu1 %v3205_v22 }
  0x44   : > { %2894 = vmatpush3.bf16.msra.mxu0 %v3195_v11 }
  0x45   : > { %2895 = vmatprep.subr.bf16.mxu0 %v3196_v12 }
  0x46   : > { %2918 = vmatpush3.bf16.msra.mxu1 %v3205_v22 }
  0x47   : > { %2919 = vmatprep.subr.bf16.mxu1 %v3206_v23 }
  0x48   : > { %2896 = vmatpush3.bf16.msra.mxu0 %v3196_v12  ;;  %v2621_v12 = vld [vmem:[%s3890_s6] ss:$0 sm:$0xff] }
  0x49   : > { %2897 = vmatprep.subr.bf16.mxu0 %v3197_v15 }
  0x4a   : > { %2920 = vmatpush3.bf16.msra.mxu1 %v3206_v23 }
  0x4b   : > { %2945 = vmatprep.subr.bf16.mxu1 %v3215_v47 }
  0x4c   : > { %2898 = vmatpush3.bf16.msra.mxu0 %v3197_v15 }
  0x4d   : > { %2899 = vmatprep.subr.bf16.mxu0 %v3198_v17 }
  0x50   : > { %2900 = vmatpush3.bf16.msra.mxu0 %v3198_v17 }
  0x51   : > { %2925 = vmatprep.subr.bf16.mxu0 %v3207_v24 }
  0x53   : > { %2902 = vmatmul.mubr.bf16.vlgmr.msra.gmra.mxu0 %v608_v20 }
  0x54   : > { %2926 = vmatpush3.bf16.msra.mxu0 %v3207_v24 }
  0x55   : > { %2927 = vmatprep.subr.bf16.mxu0 %v3208_v25 }
  0x58   : > { %2928 = vmatpush3.bf16.msra.mxu0 %v3208_v25 }
  0x59   : > { %2929 = vmatprep.subr.bf16.mxu0 %v3209_v26 }
  0x5c   : > { %2930 = vmatpush3.bf16.msra.mxu0 %v3209_v26 }
  0x5d   : > { %2931 = vmatprep.subr.bf16.mxu0 %v3210_v27 }
  0x60   : > { %2932 = vmatpush3.bf16.msra.mxu0 %v3210_v27 }
  0x61   : > { %2933 = vmatprep.subr.bf16.mxu0 %v3211_v28 }
  0x64   : > { %2934 = vmatpush3.bf16.msra.mxu0 %v3211_v28 }
  0x65   : > { %2935 = vmatprep.subr.bf16.mxu0 %v3212_v44 }
  0x68   : > { %2936 = vmatpush3.bf16.msra.mxu0 %v3212_v44 }
  0x69   : > { %2937 = vmatprep.subr.bf16.mxu0 %v3213_v45 }
  0x6c   : > { %2938 = vmatpush3.bf16.msra.mxu0 %v3213_v45 }
  0x6d   : > { %2939 = vmatprep.subr.bf16.mxu0 %v3214_v46 }
  0x70   : > { %2940 = vmatpush3.bf16.msra.mxu0 %v3214_v46 }
  0x71   : > { %2965 = vmatprep.subr.bf16.mxu0 %v3223_v6 }
 0x113   : > { %v2903_v29 = vpop.f32.mrf.mxu0 }
 0x114   : > { %v3601_v35 = vadd.f32 %v2903_v29, %v2603_v31 }
 0x115   : > { %v698_v30 = vpop.f32.mrf.mxu0 }
 0x116   : > { %v3597_v33 = vadd.f32 %v2603_v31, %v698_v30  ;;  %v715_v41 = vmax.f32 %v3601_v35, 0.0  ;;  %v3228_v30 = vld [vmem:[#allocation6 + $0x50] sm:$0xff]   ;;  %v3233_v35 = vld [vmem:[#allocation4 + $0xa8] sm:$0xff]  }
 0x117   : > { %v2904_v32 = vpop.f32.mrf.mxu0 }
 0x118   : > { %v3599_v34 = vadd.f32 %v2904_v32, %v2603_v31  ;;  %v713_v39 = vmax.f32 %v3597_v33, 0.0  ;;  %v3230_v32 = vld [vmem:[#allocation6 + $0x40] sm:$0xff]   ;;  %v3231_v33 = vld [vmem:[#allocation4 + $0xb8] sm:$0xff]  }
 0x119   : > { %v701_v36 = vpop.f32.mrf.mxu0 }
 0x11a   : > { %v3603_v37 = vadd.f32 %v2603_v31, %v701_v36  ;;  %v716_v38 = vmax.f32 %v3599_v34, 0.0  ;;  %v3229_v31 = vld [vmem:[#allocation6 + $0x48] sm:$0xff]   ;;  %v3232_v34 = vld [vmem:[#allocation4 + $0xb0] sm:$0xff]   ;;  %v3234_v36 = vld [vmem:[#allocation4 + $0xa0] sm:$0xff]  }
 0x11c   : > { %v714_v40 = vmax.f32 %v3603_v37, 0.0  ;;  %v734_v43 = vpack.c.bf16 %v716_v38, %v715_v41 }
 0x11e   : > { %v733_v42 = vpack.c.bf16 %v714_v40, %v713_v39 }
 0x120   : > { %2921 = vmatprep.mubr.bf16.mxu1 %v733_v42 }
 0x121   : > { %2922 = vmatmul.mubr.bf16.vlgmr.msra.gmra.mxu1 %v734_v43 }
 0x122   : > { %2946 = vmatpush3.bf16.msra.mxu1 %v3215_v47 }
 0x123   : > { %2947 = vmatprep.subr.bf16.mxu1 %v3216_v48 }
 0x126   : > { %2948 = vmatpush3.bf16.msra.mxu1 %v3216_v48 }
 0x127   : > { %2949 = vmatprep.subr.bf16.mxu1 %v3217_v49 }
 0x12a   : > { %2950 = vmatpush3.bf16.msra.mxu1 %v3217_v49 }
 0x12b   : > { %2951 = vmatprep.subr.bf16.mxu1 %v3218_v50 }
 0x12e   : > { %2952 = vmatpush3.bf16.msra.mxu1 %v3218_v50 }
 0x12f   : > { %2953 = vmatprep.subr.bf16.mxu1 %v3219_v2 }
 0x132   : > { %2954 = vmatpush3.bf16.msra.mxu1 %v3219_v2 }
 0x133   : > { %2955 = vmatprep.subr.bf16.mxu1 %v3220_v3 }
 0x136   : > { %2956 = vmatpush3.bf16.msra.mxu1 %v3220_v3 }
 0x137   : > { %2957 = vmatprep.subr.bf16.mxu1 %v3221_v4 }
 0x13a   : > { %2958 = vmatpush3.bf16.msra.mxu1 %v3221_v4 }
 0x13b   : > { %2959 = vmatprep.subr.bf16.mxu1 %v3222_v5 }
 0x13e   : > { %2960 = vmatpush3.bf16.msra.mxu1 %v3222_v5 }
 0x13f   : > { %2985 = vmatprep.subr.bf16.mxu1 %v3231_v33 }
 0x1e1   : > { %v2923_v51 = vpop.f32.mrf.mxu1 }
 0x1e2   : > { %v833_v57 = vadd.f32 %v2923_v51, %v2612_v53 }
 0x1e3   : > { %v824_v52 = vpop.f32.mrf.mxu1 }
 0x1e4   : > { %v825_v55 = vadd.f32 %v2612_v53, %v824_v52  ;;  %v841_v63 = vmax.f32 %v833_v57, 0.0  ;;  %v3235_v52 = vld [vmem:[#allocation4 + $0x98] sm:$0xff]   ;;  %v3240_v57 = vld [vmem:[#allocation6 + $0xb0] sm:$0xff]  }
 0x1e5   : > { %v2924_v54 = vpop.f32.mrf.mxu1 }
 0x1e6   : > { %v836_v56 = vadd.f32 %v2924_v54, %v2612_v53  ;;  %v839_v61 = vmax.f32 %v825_v55, 0.0  ;;  %v3237_v54 = vld [vmem:[#allocation4 + $0x88] sm:$0xff]   ;;  %v3238_v55 = vld [vmem:[#allocation4 + $0x80] sm:$0xff]  }
 0x1e7   : > { %v827_v58 = vpop.f32.mrf.mxu1 }
 0x1e8   : > { %v828_v59 = vadd.f32 %v2612_v53, %v827_v58  ;;  %v842_v60 = vmax.f32 %v836_v56, 0.0  ;;  %v3236_v53 = vld [vmem:[#allocation4 + $0x90] sm:$0xff]   ;;  %v3239_v56 = vld [vmem:[#allocation6 + $0xb8] sm:$0xff]   ;;  %v3241_v58 = vld [vmem:[#allocation6 + $0xa8] sm:$0xff]  }
 0x1ea   : > { %v840_v62 = vmax.f32 %v828_v59, 0.0  ;;  %v860_v1 = vpack.c.bf16 %v842_v60, %v841_v63  ;;  %v3242_v59 = vld [vmem:[#allocation6 + $0xa0] sm:$0xff]   ;;  %v3243_v60 = vld [vmem:[#allocation6 + $0x98] sm:$0xff]  }
 0x1ec   : > { %v859_v0 = vpack.c.bf16 %v840_v62, %v839_v61  ;;  %v2641_v62 = vld [vmem:[%s3890_s6 + $0x1] ss:$0 sm:$0xff] }
 0x1ee   : > { %2941 = vmatprep.mubr.bf16.mxu0 %v859_v0 }
 0x1ef   : > { %2942 = vmatmul.mubr.bf16.vlgmr.msra.gmra.mxu0 %v860_v1 }
 0x1f0   : > { %2966 = vmatpush3.bf16.msra.mxu0 %v3223_v6 }
 0x1f1   : > { %2967 = vmatprep.subr.bf16.mxu0 %v3224_v7 }
 0x1f4   : > { %2968 = vmatpush3.bf16.msra.mxu0 %v3224_v7 }
 0x1f5   : > { %2969 = vmatprep.subr.bf16.mxu0 %v3225_v8 }
 0x1f8   : > { %2970 = vmatpush3.bf16.msra.mxu0 %v3225_v8 }
 0x1f9   : > { %2971 = vmatprep.subr.bf16.mxu0 %v3226_v9 }
 0x1fc   : > { %2972 = vmatpush3.bf16.msra.mxu0 %v3226_v9 }
 0x1fd   : > { %2973 = vmatprep.subr.bf16.mxu0 %v3227_v10 }
 0x200   : > { %2974 = vmatpush3.bf16.msra.mxu0 %v3227_v10 }
 0x201   : > { %2975 = vmatprep.subr.bf16.mxu0 %v3228_v30 }
 0x204   : > { %2976 = vmatpush3.bf16.msra.mxu0 %v3228_v30 }
 0x205   : > { %2977 = vmatprep.subr.bf16.mxu0 %v3229_v31 }
 0x208   : > { %2978 = vmatpush3.bf16.msra.mxu0 %v3229_v31 }
 0x209   : > { %2979 = vmatprep.subr.bf16.mxu0 %v3230_v32 }
 0x20c   : > { %2980 = vmatpush3.bf16.msra.mxu0 %v3230_v32 }
 0x20d   : > { %3005 = vmatprep.subr.bf16.mxu0 %v3239_v56 }
 0x2af   : > { %v2943_v11 = vpop.f32.mrf.mxu0 }
 0x2b0   : > { %v959_v15 = vadd.f32 %v2943_v11, %v2621_v12 }
 0x2b1   : > { %v950_v13 = vpop.f32.mrf.mxu0 }
 0x2b2   : > { %v951_v14 = vadd.f32 %v2621_v12, %v950_v13  ;;  %v3633_v22 = vadd.f32 %v959_v15, %v715_v41 }
 0x2b3   : > { %v2944_v16 = vpop.f32.mrf.mxu0 }
 0x2b4   : > { %v962_v17 = vadd.f32 %v2944_v16, %v2621_v12  ;;  %v3625_v19 = vadd.f32 %v951_v14, %v713_v39  ;;  %v971_v27 = vmax.f32 %v3633_v22, 0.0  ;;  %v2631_v39 = vld [vmem:[%s3888_s4 + $0x1] ss:$0 sm:$0xff]  ;;  %v3244_v16 = vld [vmem:[#allocation6 + $0x90] sm:$0xff]   ;;  %v3250_v22 = vld [vmem:[#allocation4 + $0xe0] sm:$0xff]  }
 0x2b5   : > { %v953_v18 = vpop.f32.mrf.mxu0 }
 0x2b6   : > { %v3629_v20 = vadd.f32 %v962_v17, %v716_v38  ;;  %v954_v21 = vadd.f32 %v2621_v12, %v953_v18  ;;  %v969_v25 = vmax.f32 %v3625_v19, 0.0  ;;  %v3245_v17 = vld [vmem:[#allocation6 + $0x88] sm:$0xff]   ;;  %v3246_v18 = vld [vmem:[#allocation6 + $0x80] sm:$0xff]   ;;  %v3247_v19 = vld [vmem:[#allocation4 + $0xf8] sm:$0xff]  }
 0x2b8   : > { %v3637_v23 = vadd.f32 %v954_v21, %v714_v40  ;;  %v972_v24 = vmax.f32 %v3629_v20, 0.0  ;;  %v3248_v20 = vld [vmem:[#allocation4 + $0xf0] sm:$0xff]   ;;  %v3249_v21 = vld [vmem:[#allocation4 + $0xe8] sm:$0xff]  }
 0x2ba   : > { %v970_v26 = vmax.f32 %v3637_v23, 0.0  ;;  %v991_v29 = vpack.c.bf16 %v972_v24, %v971_v27 }
 0x2bc   : > { %v990_v28 = vpack.c.bf16 %v970_v26, %v969_v25 }
 0x2be   : > { %2961 = vmatprep.mubr.bf16.mxu1 %v990_v28 }
 0x2bf   : > { %2962 = vmatmul.mubr.bf16.vlgmr.msra.gmra.mxu1 %v991_v29 }
 0x2c0   : > { %2986 = vmatpush3.bf16.msra.mxu1 %v3231_v33 }
 0x2c1   : > { %2987 = vmatprep.subr.bf16.mxu1 %v3232_v34 }
 0x2c4   : > { %2988 = vmatpush3.bf16.msra.mxu1 %v3232_v34 }
 0x2c5   : > { %2989 = vmatprep.subr.bf16.mxu1 %v3233_v35 }
 0x2c8   : > { %2990 = vmatpush3.bf16.msra.mxu1 %v3233_v35 }
 0x2c9   : > { %2991 = vmatprep.subr.bf16.mxu1 %v3234_v36 }
 0x2cc   : > { %2992 = vmatpush3.bf16.msra.mxu1 %v3234_v36 }
 0x2cd   : > { %2993 = vmatprep.subr.bf16.mxu1 %v3235_v52 }
 0x2d0   : > { %2994 = vmatpush3.bf16.msra.mxu1 %v3235_v52 }
 0x2d1   : > { %2995 = vmatprep.subr.bf16.mxu1 %v3236_v53 }
 0x2d4   : > { %2996 = vmatpush3.bf16.msra.mxu1 %v3236_v53 }
 0x2d5   : > { %2997 = vmatprep.subr.bf16.mxu1 %v3237_v54 }
 0x2d8   : > { %2998 = vmatpush3.bf16.msra.mxu1 %v3237_v54 }
 0x2d9   : > { %2999 = vmatprep.subr.bf16.mxu1 %v3238_v55 }
 0x2dc   : > { %3000 = vmatpush3.bf16.msra.mxu1 %v3238_v55 }
 0x2dd   : > { %3025 = vmatprep.subr.bf16.mxu1 %v3247_v19 }
 0x37f   : > { %v2963_v37 = vpop.f32.mrf.mxu1 }
 0x380   : > { %v1091_v43 = vadd.f32 %v2963_v37, %v2631_v39 }
 0x381   : > { %v1082_v38 = vpop.f32.mrf.mxu1 }
 0x382   : > { %v1083_v41 = vadd.f32 %v2631_v39, %v1082_v38  ;;  %v1099_v49 = vmax.f32 %v1091_v43, 0.0  ;;  %v3251_v38 = vld [vmem:[#allocation4 + $0xd8] sm:$0xff]   ;;  %v3256_v43 = vld [vmem:[#allocation6 + $0xf0] sm:$0xff]  }
 0x383   : > { %v2964_v40 = vpop.f32.mrf.mxu1 }
 0x384   : > { %v1094_v42 = vadd.f32 %v2964_v40, %v2631_v39  ;;  %v1097_v47 = vmax.f32 %v1083_v41, 0.0  ;;  %v3253_v40 = vld [vmem:[#allocation4 + $0xc8] sm:$0xff]   ;;  %v3254_v41 = vld [vmem:[#allocation4 + $0xc0] sm:$0xff]  }
 0x385   : > { %v1085_v44 = vpop.f32.mrf.mxu1 }
 0x386   : > { %v1086_v45 = vadd.f32 %v2631_v39, %v1085_v44  ;;  %v1100_v46 = vmax.f32 %v1094_v42, 0.0  ;;  %v3252_v39 = vld [vmem:[#allocation4 + $0xd0] sm:$0xff]   ;;  %v3255_v42 = vld [vmem:[#allocation6 + $0xf8] sm:$0xff]   ;;  %v3257_v44 = vld [vmem:[#allocation6 + $0xe8] sm:$0xff]  }
 0x388   : > { %v1098_v48 = vmax.f32 %v1086_v45, 0.0  ;;  %v1119_v51 = vpack.c.bf16 %v1100_v46, %v1099_v49  ;;  %v3258_v45 = vld [vmem:[#allocation6 + $0xe0] sm:$0xff]   ;;  %v3259_v46 = vld [vmem:[#allocation6 + $0xd8] sm:$0xff]  }
 0x38a   : > { %v1118_v50 = vpack.c.bf16 %v1098_v48, %v1097_v47  ;;  %v2661_v48 = vld [vmem:[%s3890_s6 + $0x2] ss:$0 sm:$0xff] }
 0x38c   : > { %2981 = vmatprep.mubr.bf16.mxu0 %v1118_v50 }
 0x38d   : > { %2982 = vmatmul.mubr.bf16.vlgmr.msra.gmra.mxu0 %v1119_v51 }
 0x38e   : > { %3006 = vmatpush3.bf16.msra.mxu0 %v3239_v56 }
 0x38f   : > { %3007 = vmatprep.subr.bf16.mxu0 %v3240_v57 }
 0x392   : > { %3008 = vmatpush3.bf16.msra.mxu0 %v3240_v57 }
 0x393   : > { %3009 = vmatprep.subr.bf16.mxu0 %v3241_v58 }
 0x396   : > { %3010 = vmatpush3.bf16.msra.mxu0 %v3241_v58 }
 0x397   : > { %3011 = vmatprep.subr.bf16.mxu0 %v3242_v59 }
 0x39a   : > { %3012 = vmatpush3.bf16.msra.mxu0 %v3242_v59 }
 0x39b   : > { %3013 = vmatprep.subr.bf16.mxu0 %v3243_v60 }
 0x39e   : > { %3014 = vmatpush3.bf16.msra.mxu0 %v3243_v60 }
 0x39f   : > { %3015 = vmatprep.subr.bf16.mxu0 %v3244_v16 }
 0x3a2   : > { %3016 = vmatpush3.bf16.msra.mxu0 %v3244_v16 }
 0x3a3   : > { %3017 = vmatprep.subr.bf16.mxu0 %v3245_v17 }
 0x3a6   : > { %3018 = vmatpush3.bf16.msra.mxu0 %v3245_v17 }
 0x3a7   : > { %3019 = vmatprep.subr.bf16.mxu0 %v3246_v18 }
 0x3aa   : > { %3020 = vmatpush3.bf16.msra.mxu0 %v3246_v18 }
 0x3ab   : > { %3045 = vmatprep.subr.bf16.mxu0 %v3255_v42 }
 0x44d   : > { %v2983_v61 = vpop.f32.mrf.mxu0 }
 0x44e   : > { %v1219_v1 = vadd.f32 %v2983_v61, %v2641_v62 }
 0x44f   : > { %v1210_v63 = vpop.f32.mrf.mxu0 }
 0x450   : > { %v1211_v0 = vadd.f32 %v2641_v62, %v1210_v63  ;;  %v3667_v8 = vadd.f32 %v1219_v1, %v971_v27 }
 0x451   : > { %v2984_v2 = vpop.f32.mrf.mxu0 }
 0x452   : > { %v1222_v3 = vadd.f32 %v2984_v2, %v2641_v62  ;;  %v3659_v5 = vadd.f32 %v1211_v0, %v969_v25  ;;  %v1231_v13 = vmax.f32 %v3667_v8, 0.0  ;;  %v2651_v25 = vld [vmem:[%s3888_s4 + $0x2] ss:$0 sm:$0xff]  ;;  %v3260_v2 = vld [vmem:[#allocation6 + $0xd0] sm:$0xff]  }
 0x453   : > { %v1213_v4 = vpop.f32.mrf.mxu0  ;;  %v3266_v8 = vld [vmem:[#allocation4 + $0x120] sm:$0xff]  }
 0x454   : > { %v3663_v6 = vadd.f32 %v1222_v3, %v972_v24  ;;  %v1214_v7 = vadd.f32 %v2641_v62, %v1213_v4  ;;  %v1229_v11 = vmax.f32 %v3659_v5, 0.0  ;;  %v3261_v3 = vld [vmem:[#allocation6 + $0xc8] sm:$0xff]   ;;  %v3262_v4 = vld [vmem:[#allocation6 + $0xc0] sm:$0xff]   ;;  %v3263_v5 = vld [vmem:[#allocation4 + $0x138] sm:$0xff]  }
 0x456   : > { %v3671_v9 = vadd.f32 %v1214_v7, %v970_v26  ;;  %v1232_v10 = vmax.f32 %v3663_v6, 0.0  ;;  %v3264_v6 = vld [vmem:[#allocation4 + $0x130] sm:$0xff]   ;;  %v3265_v7 = vld [vmem:[#allocation4 + $0x128] sm:$0xff]  }
 0x458   : > { %v1230_v12 = vmax.f32 %v3671_v9, 0.0  ;;  %v1251_v15 = vpack.c.bf16 %v1232_v10, %v1231_v13 }
 0x45a   : > { %v1250_v14 = vpack.c.bf16 %v1230_v12, %v1229_v11 }
 0x45c   : > { %3001 = vmatprep.mubr.bf16.mxu1 %v1250_v14 }
 0x45d   : > { %3002 = vmatmul.mubr.bf16.vlgmr.msra.gmra.mxu1 %v1251_v15 }
 0x45e   : > { %3026 = vmatpush3.bf16.msra.mxu1 %v3247_v19 }
 0x45f   : > { %3027 = vmatprep.subr.bf16.mxu1 %v3248_v20 }
 0x462   : > { %3028 = vmatpush3.bf16.msra.mxu1 %v3248_v20 }
 0x463   : > { %3029 = vmatprep.subr.bf16.mxu1 %v3249_v21 }
 0x466   : > { %3030 = vmatpush3.bf16.msra.mxu1 %v3249_v21 }
 0x467   : > { %3031 = vmatprep.subr.bf16.mxu1 %v3250_v22 }
 0x46a   : > { %3032 = vmatpush3.bf16.msra.mxu1 %v3250_v22 }
 0x46b   : > { %3033 = vmatprep.subr.bf16.mxu1 %v3251_v38 }
 0x46e   : > { %3034 = vmatpush3.bf16.msra.mxu1 %v3251_v38 }
 0x46f   : > { %3035 = vmatprep.subr.bf16.mxu1 %v3252_v39 }
 0x472   : > { %3036 = vmatpush3.bf16.msra.mxu1 %v3252_v39 }
 0x473   : > { %3037 = vmatprep.subr.bf16.mxu1 %v3253_v40 }
 0x476   : > { %3038 = vmatpush3.bf16.msra.mxu1 %v3253_v40 }
 0x477   : > { %3039 = vmatprep.subr.bf16.mxu1 %v3254_v41 }
 0x47a   : > { %3040 = vmatpush3.bf16.msra.mxu1 %v3254_v41 }
 0x47b   : > { %3065 = vmatprep.subr.bf16.mxu1 %v3263_v5 }
 0x51d   : > { %v3003_v23 = vpop.f32.mrf.mxu1 }
 0x51e   : > { %v1351_v29 = vadd.f32 %v3003_v23, %v2651_v25 }
 0x51f   : > { %v1342_v24 = vpop.f32.mrf.mxu1 }
 0x520   : > { %v1343_v27 = vadd.f32 %v2651_v25, %v1342_v24  ;;  %v1359_v35 = vmax.f32 %v1351_v29, 0.0  ;;  %v3267_v24 = vld [vmem:[#allocation4 + $0x118] sm:$0xff]   ;;  %v3272_v29 = vld [vmem:[#allocation6 + $0x130] sm:$0xff]  }
 0x521   : > { %v3004_v26 = vpop.f32.mrf.mxu1 }
 0x522   : > { %v1354_v28 = vadd.f32 %v3004_v26, %v2651_v25  ;;  %v1357_v33 = vmax.f32 %v1343_v27, 0.0  ;;  %v3269_v26 = vld [vmem:[#allocation4 + $0x108] sm:$0xff]   ;;  %v3270_v27 = vld [vmem:[#allocation4 + $0x100] sm:$0xff]  }
 0x523   : > { %v1345_v30 = vpop.f32.mrf.mxu1 }
 0x524   : > { %v1346_v31 = vadd.f32 %v2651_v25, %v1345_v30  ;;  %v1360_v32 = vmax.f32 %v1354_v28, 0.0  ;;  %v3268_v25 = vld [vmem:[#allocation4 + $0x110] sm:$0xff]   ;;  %v3271_v28 = vld [vmem:[#allocation6 + $0x138] sm:$0xff]   ;;  %v3273_v30 = vld [vmem:[#allocation6 + $0x128] sm:$0xff]  }
 0x526   : > { %v1358_v34 = vmax.f32 %v1346_v31, 0.0  ;;  %v1379_v37 = vpack.c.bf16 %v1360_v32, %v1359_v35  ;;  %v3274_v31 = vld [vmem:[#allocation6 + $0x120] sm:$0xff]   ;;  %v3275_v32 = vld [vmem:[#allocation6 + $0x118] sm:$0xff]  }
 0x528   : > { %v1378_v36 = vpack.c.bf16 %v1358_v34, %v1357_v33  ;;  %v2681_v34 = vld [vmem:[%s3890_s6 + $0x3] ss:$0 sm:$0xff] }
 0x52a   : > { %3021 = vmatprep.mubr.bf16.mxu0 %v1378_v36 }
 0x52b   : > { %3022 = vmatmul.mubr.bf16.vlgmr.msra.gmra.mxu0 %v1379_v37 }
 0x52c   : > { %3046 = vmatpush3.bf16.msra.mxu0 %v3255_v42 }
 0x52d   : > { %3047 = vmatprep.subr.bf16.mxu0 %v3256_v43 }
 0x530   : > { %3048 = vmatpush3.bf16.msra.mxu0 %v3256_v43 }
 0x531   : > { %3049 = vmatprep.subr.bf16.mxu0 %v3257_v44 }
 0x534   : > { %3050 = vmatpush3.bf16.msra.mxu0 %v3257_v44 }
 0x535   : > { %3051 = vmatprep.subr.bf16.mxu0 %v3258_v45 }
 0x538   : > { %3052 = vmatpush3.bf16.msra.mxu0 %v3258_v45 }
 0x539   : > { %3053 = vmatprep.subr.bf16.mxu0 %v3259_v46 }
 0x53c   : > { %3054 = vmatpush3.bf16.msra.mxu0 %v3259_v46 }
 0x53d   : > { %3055 = vmatprep.subr.bf16.mxu0 %v3260_v2 }
 0x540   : > { %3056 = vmatpush3.bf16.msra.mxu0 %v3260_v2 }
 0x541   : > { %3057 = vmatprep.subr.bf16.mxu0 %v3261_v3 }
 0x544   : > { %3058 = vmatpush3.bf16.msra.mxu0 %v3261_v3 }
 0x545   : > { %3059 = vmatprep.subr.bf16.mxu0 %v3262_v4 }
 0x548   : > { %3060 = vmatpush3.bf16.msra.mxu0 %v3262_v4 }
 0x549   : > { %3085 = vmatprep.subr.bf16.mxu0 %v3271_v28 }
 0x5eb   : > { %v3023_v47 = vpop.f32.mrf.mxu0 }
 0x5ec   : > { %v1479_v51 = vadd.f32 %v3023_v47, %v2661_v48 }
 0x5ed   : > { %v1470_v49 = vpop.f32.mrf.mxu0 }
 0x5ee   : > { %v1471_v50 = vadd.f32 %v2661_v48, %v1470_v49  ;;  %v3701_v58 = vadd.f32 %v1479_v51, %v1231_v13 }
 0x5ef   : > { %v3024_v52 = vpop.f32.mrf.mxu0 }
 0x5f0   : > { %v1482_v53 = vadd.f32 %v3024_v52, %v2661_v48  ;;  %v3693_v55 = vadd.f32 %v1471_v50, %v1229_v11  ;;  %v1491_v63 = vmax.f32 %v3701_v58, 0.0  ;;  %v2671_v11 = vld [vmem:[%s3888_s4 + $0x3] ss:$0 sm:$0xff]  ;;  %v3276_v52 = vld [vmem:[#allocation6 + $0x110] sm:$0xff]  }
 0x5f1   : > { %v1473_v54 = vpop.f32.mrf.mxu0  ;;  %v3282_v58 = vld [vmem:[%s3891_s7 + $0x20] sm:$0xff]  }
 0x5f2   : > { %v3697_v56 = vadd.f32 %v1482_v53, %v1232_v10  ;;  %v1474_v57 = vadd.f32 %v2661_v48, %v1473_v54  ;;  %v1489_v61 = vmax.f32 %v3693_v55, 0.0  ;;  %v3277_v53 = vld [vmem:[#allocation6 + $0x108] sm:$0xff]   ;;  %v3278_v54 = vld [vmem:[#allocation6 + $0x100] sm:$0xff]   ;;  %v3279_v55 = vld [vmem:[%s3891_s7 + $0x38] sm:$0xff]  }
 0x5f4   : > { %v3705_v59 = vadd.f32 %v1474_v57, %v1230_v12  ;;  %v1492_v60 = vmax.f32 %v3697_v56, 0.0  ;;  %v3280_v56 = vld [vmem:[%s3891_s7 + $0x30] sm:$0xff]   ;;  %v3281_v57 = vld [vmem:[%s3891_s7 + $0x28] sm:$0xff]  }
 0x5f6   : > { %v1490_v62 = vmax.f32 %v3705_v59, 0.0  ;;  %v1511_v1 = vpack.c.bf16 %v1492_v60, %v1491_v63 }
 0x5f8   : > { %v1510_v0 = vpack.c.bf16 %v1490_v62, %v1489_v61 }
 0x5fa   : > { %3041 = vmatprep.mubr.bf16.mxu1 %v1510_v0 }
 0x5fb   : > { %3042 = vmatmul.mubr.bf16.vlgmr.msra.gmra.mxu1 %v1511_v1 }
 0x5fc   : > { %3066 = vmatpush3.bf16.msra.mxu1 %v3263_v5 }
 0x5fd   : > { %3067 = vmatprep.subr.bf16.mxu1 %v3264_v6 }
 0x600   : > { %3068 = vmatpush3.bf16.msra.mxu1 %v3264_v6 }
 0x601   : > { %3069 = vmatprep.subr.bf16.mxu1 %v3265_v7 }
 0x604   : > { %3070 = vmatpush3.bf16.msra.mxu1 %v3265_v7 }
 0x605   : > { %3071 = vmatprep.subr.bf16.mxu1 %v3266_v8 }
 0x608   : > { %3072 = vmatpush3.bf16.msra.mxu1 %v3266_v8 }
 0x609   : > { %3073 = vmatprep.subr.bf16.mxu1 %v3267_v24 }
 0x60c   : > { %3074 = vmatpush3.bf16.msra.mxu1 %v3267_v24 }
 0x60d   : > { %3075 = vmatprep.subr.bf16.mxu1 %v3268_v25 }
 0x610   : > { %3076 = vmatpush3.bf16.msra.mxu1 %v3268_v25 }
 0x611   : > { %3077 = vmatprep.subr.bf16.mxu1 %v3269_v26 }
 0x614   : > { %3078 = vmatpush3.bf16.msra.mxu1 %v3269_v26 }
 0x615   : > { %3079 = vmatprep.subr.bf16.mxu1 %v3270_v27 }
 0x618   : > { %3080 = vmatpush3.bf16.msra.mxu1 %v3270_v27 }
 0x619   : > { %3105 = vmatprep.subr.bf16.mxu1 %v3279_v55 }
 0x6bb   : > { %v3043_v9 = vpop.f32.mrf.mxu1 }
 0x6bc   : > { %v1611_v15 = vadd.f32 %v3043_v9, %v2671_v11 }
 0x6bd   : > { %v1602_v10 = vpop.f32.mrf.mxu1 }
 0x6be   : > { %v1603_v13 = vadd.f32 %v2671_v11, %v1602_v10  ;;  %v1619_v21 = vmax.f32 %v1611_v15, 0.0  ;;  %v3283_v10 = vld [vmem:[%s3891_s7 + $0x18] sm:$0xff]   ;;  %v2701_v15 = vld [vmem:[%s3890_s6 + $0x4] ss:$0 sm:$0xff] }
 0x6bf   : > { %v3044_v12 = vpop.f32.mrf.mxu1 }
 0x6c0   : > { %v1614_v14 = vadd.f32 %v3044_v12, %v2671_v11  ;;  %v1617_v19 = vmax.f32 %v1603_v13, 0.0  ;;  %v3285_v12 = vld [vmem:[%s3891_s7 + $0x8] sm:$0xff]   ;;  %v3286_v13 = vld [vmem:[%s3891_s7] sm:$0xff]  }
 0x6c1   : > { %v1605_v16 = vpop.f32.mrf.mxu1 }
 0x6c2   : > { %v1606_v17 = vadd.f32 %v2671_v11, %v1605_v16  ;;  %v1620_v18 = vmax.f32 %v1614_v14, 0.0  ;;  %v3284_v11 = vld [vmem:[%s3891_s7 + $0x10] sm:$0xff]  }
 0x6c4   : > { %v1618_v20 = vmax.f32 %v1606_v17, 0.0  ;;  %v1639_v23 = vpack.c.bf16 %v1620_v18, %v1619_v21 }
 0x6c6   : > { %v1638_v22 = vpack.c.bf16 %v1618_v20, %v1617_v19 }
 0x6c8   : > { %3061 = vmatprep.mubr.bf16.mxu0 %v1638_v22 }
 0x6c9   : > { %3062 = vmatmul.mubr.bf16.vlgmr.msra.gmra.mxu0 %v1639_v23 }
 0x6ca   : > { %3086 = vmatpush3.bf16.msra.mxu0 %v3271_v28 }
 0x6cb   : > { %3087 = vmatprep.subr.bf16.mxu0 %v3272_v29 }
 0x6ce   : > { %3088 = vmatpush3.bf16.msra.mxu0 %v3272_v29 }
 0x6cf   : > { %3089 = vmatprep.subr.bf16.mxu0 %v3273_v30 }
 0x6d2   : > { %3090 = vmatpush3.bf16.msra.mxu0 %v3273_v30 }
 0x6d3   : > { %3091 = vmatprep.subr.bf16.mxu0 %v3274_v31 }
 0x6d6   : > { %3092 = vmatpush3.bf16.msra.mxu0 %v3274_v31 }
 0x6d7   : > { %3093 = vmatprep.subr.bf16.mxu0 %v3275_v32 }
 0x6da   : > { %3094 = vmatpush3.bf16.msra.mxu0 %v3275_v32 }
 0x6db   : > { %3095 = vmatprep.subr.bf16.mxu0 %v3276_v52 }
 0x6de   : > { %3096 = vmatpush3.bf16.msra.mxu0 %v3276_v52 }
 0x6df   : > { %3097 = vmatprep.subr.bf16.mxu0 %v3277_v53 }
 0x6e2   : > { %3098 = vmatpush3.bf16.msra.mxu0 %v3277_v53 }
 0x6e3   : > { %3099 = vmatprep.subr.bf16.mxu0 %v3278_v54 }
 0x6e6   : > { %3100 = vmatpush3.bf16.msra.mxu0 %v3278_v54 }
 0x789   : > { %v3063_v33 = vpop.f32.mrf.mxu0 }
 0x78a   : > { %v1739_v37 = vadd.f32 %v3063_v33, %v2681_v34  ;;  %v2710_v33 = vld [vmem:[%s3892_s8] ss:$0 sm:$0xff] }
 0x78b   : > { %v1730_v35 = vpop.f32.mrf.mxu0 }
 0x78c   : > { %v1731_v36 = vadd.f32 %v2681_v34, %v1730_v35  ;;  %v3735_v44 = vadd.f32 %v1739_v37, %v1491_v63  ;;  %v2719_v37 = vld [vmem:[%s3893_s9] ss:$0 sm:$0xff] }
 0x78d   : > { %v3064_v38 = vpop.f32.mrf.mxu0 }
 0x78e   : > { %v1742_v39 = vadd.f32 %v3064_v38, %v2681_v34  ;;  %v3727_v41 = vadd.f32 %v1731_v36, %v1489_v61  ;;  %v1751_v49 = vmax.f32 %v3735_v44, 0.0  ;;  %v2691_v61 = vld [vmem:[%s3888_s4 + $0x4] ss:$0 sm:$0xff] }
 0x78f   : > { %v1733_v40 = vpop.f32.mrf.mxu0 }
 0x790   : > { %v3731_v42 = vadd.f32 %v1742_v39, %v1492_v60  ;;  %v1734_v43 = vadd.f32 %v2681_v34, %v1733_v40  ;;  %v1749_v47 = vmax.f32 %v3727_v41, 0.0 }
 0x792   : > { %v3739_v45 = vadd.f32 %v1734_v43, %v1490_v62  ;;  %v1752_v46 = vmax.f32 %v3731_v42, 0.0 }
 0x794   : > { %v1750_v48 = vmax.f32 %v3739_v45, 0.0  ;;  %v1771_v51 = vpack.c.bf16 %v1752_v46, %v1751_v49 }
 0x796   : > { %v1770_v50 = vpack.c.bf16 %v1750_v48, %v1749_v47 }
 0x798   : > { %3081 = vmatprep.mubr.bf16.mxu1 %v1770_v50 }
 0x799   : > { %3082 = vmatmul.mubr.bf16.vlgmr.msra.gmra.mxu1 %v1771_v51 }
 0x79a   : > { %3106 = vmatpush3.bf16.msra.mxu1 %v3279_v55  ;;  %v3403_v55 = vmov 0  }
 0x79b   : > { %3107 = vmatprep.subr.bf16.mxu1 %v3280_v56  ;;  %3190 = vset.pattern.permute.xlu1 %v3403_v55 }
 0x79c   : > { %3189 = vset.pattern.permute.xlu0 %v3403_v55 }
 0x79e   : > { %3108 = vmatpush3.bf16.msra.mxu1 %v3280_v56  ;;  %v3287_v56 = vld [vmem:[%s3895_s11 + $0x38] sm:$0xff]  }
 0x79f   : > { %3109 = vmatprep.subr.bf16.mxu1 %v3281_v57  ;;  %3125 = vmatprep.subr.bf16.mxu0 %v3287_v56 }
 0x7a2   : > { %3110 = vmatpush3.bf16.msra.mxu1 %v3281_v57  ;;  %v3288_v57 = vld [vmem:[%s3895_s11 + $0x30] sm:$0xff]  }
 0x7a3   : > { %3111 = vmatprep.subr.bf16.mxu1 %v3282_v58 }
 0x7a6   : > { %3112 = vmatpush3.bf16.msra.mxu1 %v3282_v58  ;;  %v3289_v58 = vld [vmem:[%s3895_s11 + $0x28] sm:$0xff]  }
 0x7a7   : > { %3113 = vmatprep.subr.bf16.mxu1 %v3283_v10 }
 0x7aa   : > { %3114 = vmatpush3.bf16.msra.mxu1 %v3283_v10 }
 0x7ab   : > { %3115 = vmatprep.subr.bf16.mxu1 %v3284_v11 }
 0x7ae   : > { %3116 = vmatpush3.bf16.msra.mxu1 %v3284_v11 }
 0x7af   : > { %3117 = vmatprep.subr.bf16.mxu1 %v3285_v12 }
 0x7b2   : > { %3118 = vmatpush3.bf16.msra.mxu1 %v3285_v12 }
 0x7b3   : > { %3119 = vmatprep.subr.bf16.mxu1 %v3286_v13 }
 0x7b6   : > { %3120 = vmatpush3.bf16.msra.mxu1 %v3286_v13 }
 0x859   : > { %v3083_v59 = vpop.f32.mrf.mxu1 }
 0x85a   : > { %v1871_v1 = vadd.f32 %v3083_v59, %v2691_v61  ;;  %v3290_v59 = vld [vmem:[%s3895_s11 + $0x20] sm:$0xff]  }
 0x85b   : > { %v1862_v60 = vpop.f32.mrf.mxu1 }
 0x85c   : > { %v1863_v63 = vadd.f32 %v2691_v61, %v1862_v60  ;;  %v1879_v7 = vmax.f32 %v1871_v1, 0.0  ;;  %v3291_v60 = vld [vmem:[%s3895_s11 + $0x18] sm:$0xff]  }
 0x85d   : > { %v3084_v62 = vpop.f32.mrf.mxu1 }
 0x85e   : > { %v1874_v0 = vadd.f32 %v3084_v62, %v2691_v61  ;;  %v1877_v5 = vmax.f32 %v1863_v63, 0.0 }
 0x85f   : > { %v1865_v2 = vpop.f32.mrf.mxu1 }
 0x860   : > { %v1866_v3 = vadd.f32 %v2691_v61, %v1865_v2  ;;  %v1880_v4 = vmax.f32 %v1874_v0, 0.0  ;;  %v2720_v61 = vld [vmem:[#allocation2] ss:$0 sm:$0xff] }
 0x862   : > { %v1878_v6 = vmax.f32 %v1866_v3, 0.0  ;;  %v1899_v9 = vpack.c.bf16 %v1880_v4, %v1879_v7 }
 0x864   : > { %v1898_v8 = vpack.c.bf16 %v1878_v6, %v1877_v5 }
 0x866   : > { %3101 = vmatprep.mubr.bf16.mxu0 %v1898_v8 }
 0x867   : > { %3102 = vmatmul.mubr.bf16.vlgmr.msra.gmra.mxu0 %v1899_v9 }
 0x868   : > { %3126 = vmatpush3.bf16.msra.mxu0 %v3287_v56 }
 0x869   : > { %3127 = vmatprep.subr.bf16.mxu0 %v3288_v57 }
 0x86c   : > { %3128 = vmatpush3.bf16.msra.mxu0 %v3288_v57 }
 0x86d   : > { %3129 = vmatprep.subr.bf16.mxu0 %v3289_v58 }
 0x870   : > { %3130 = vmatpush3.bf16.msra.mxu0 %v3289_v58 }
 0x871   : > { %3131 = vmatprep.subr.bf16.mxu0 %v3290_v59 }
 0x874   : > { %3132 = vmatpush3.bf16.msra.mxu0 %v3290_v59 }
 0x875   : > { %3133 = vmatprep.subr.bf16.mxu0 %v3291_v60 }
 0x878   : > { %3134 = vmatpush3.bf16.msra.mxu0 %v3291_v60 }
 0x927   : > { %v3103_v14 = vpop.f32.mrf.mxu0 }
 0x928   : > { %v1999_v18 = vadd.f32 %v3103_v14, %v2701_v15 }
 0x929   : > { %v1990_v16 = vpop.f32.mrf.mxu0 }
 0x92a   : > { %v1991_v17 = vadd.f32 %v2701_v15, %v1990_v16  ;;  %v3793_v25 = vadd.f32 %v1999_v18, %v1751_v49  ;;  %v3292_v18 = vld [vmem:[%s3895_s11 + $0x10] sm:$0xff]  }
 0x92b   : > { %v3104_v19 = vpop.f32.mrf.mxu0  ;;  %3135 = vmatprep.subr.bf16.mxu0 %v3292_v18 }
 0x92c   : > { %v2002_v20 = vadd.f32 %v3104_v19, %v2701_v15  ;;  %v3785_v22 = vadd.f32 %v1991_v17, %v1749_v47  ;;  %v2011_v30 = vmax.f32 %v3793_v25, 0.0  ;;  %3136 = vmatpush3.bf16.msra.mxu0 %v3292_v18 }
 0x92d   : > { %v1993_v21 = vpop.f32.mrf.mxu0 }
 0x92e   : > { %v3789_v23 = vadd.f32 %v2002_v20, %v1752_v46  ;;  %v1994_v24 = vadd.f32 %v2701_v15, %v1993_v21  ;;  %v2009_v28 = vmax.f32 %v3785_v22, 0.0  ;;  %v3293_v20 = vld [vmem:[%s3895_s11 + $0x8] sm:$0xff]  }
 0x92f   : > { %3137 = vmatprep.subr.bf16.mxu0 %v3293_v20  ;;  %v3297_v22 = vld [vmem:[%s3897_s13 + $0x8] sm:$0xff]  }
 0x930   : > { %v3797_v26 = vadd.f32 %v1994_v24, %v1750_v48  ;;  %v2012_v27 = vmax.f32 %v3789_v23, 0.0  ;;  %3138 = vmatpush3.bf16.msra.mxu0 %v3293_v20  ;;  %v3294_v24 = vld [vmem:[%s3895_s11] sm:$0xff]  }
 0x931   : > { %3139 = vmatprep.subr.bf16.mxu0 %v3294_v24  ;;  %v3298_v23 = vld [vmem:[%s3897_s13] sm:$0xff]  }
 0x932   : > { %v2010_v29 = vmax.f32 %v3797_v26, 0.0  ;;  %v2030_v32 = vpack.c.bf16 %v2012_v27, %v2011_v30 }
 0x934   : > { %v2029_v31 = vpack.c.bf16 %v2010_v29, %v2009_v28  ;;  %3140 = vmatpush3.bf16.msra.mxu0 %v3294_v24 }
 0x936   : > { %3121 = vmatprep.mubr.bf16.mxu1 %v2029_v31 }
 0x937   : > { %3122 = vmatmul.mubr.bf16.vlgmr.msra.gmra.mxu1 %v2030_v32 }
 0x9f7   : > { %v3123_v34 = vpop.f32.mrf.mxu1 }
 0x9f8   : > { %v2129_v35 = vadd.f32 %v3123_v34, %v2710_v33 }
 0x9f9   : > { %v2120_v36 = vpop.f32.mrf.mxu1 }
 0x9fa   : > { %v2137_v38 = vmax.f32 %v2129_v35, 0.0  ;;  %v2121_v39 = vadd.f32 %v2710_v33, %v2120_v36 }
 0x9fb   : > { %v3124_v40 = vpop.f32.mrf.mxu1 }
 0x9fc   : > { %v2135_v41 = vmax.f32 %v2121_v39, 0.0  ;;  %v2132_v42 = vadd.f32 %v3124_v40, %v2710_v33  ;;  %v2148_v43 = vmul.f32 %v2719_v37, %v2137_v38 }
 0x9fd   : > { %v2123_v44 = vpop.f32.mrf.mxu1 }
 0x9fe   : > { %v2138_v45 = vmax.f32 %v2132_v42, 0.0  ;;  %v2124_v46 = vadd.f32 %v2710_v33, %v2123_v44  ;;  %v2157_v47 = vsel %vm2150_vm0, %v2148_v43, 0.0  ;;  %v2146_v48 = vmul.f32 %v2719_v37, %v2135_v41  ;;  %v3295_v33 = vld [vmem:[%s3897_s13 + $0x18] sm:$0xff]   ;;  %v3296_v44 = vld [vmem:[%s3897_s13 + $0x10] sm:$0xff]  }
 0x9ff   : > { %2158 = vadd.xlane.f32.xlu1 %v2157_v47  ;;  %3145 = vmatprep.subr.bf16.mxu1 %v3295_v33 }
 0xa00   : > { %v2136_v49 = vmax.f32 %v2124_v46, 0.0  ;;  %v2151_v50 = vsel %vm2150_vm0, %v2146_v48, 0.0  ;;  %v2149_v51 = vmul.f32 %v2719_v37, %v2138_v45  ;;  %3146 = vmatpush3.bf16.msra.mxu1 %v3295_v33 }
 0xa01   : > { %2152 = vadd.xlane.f32.xlu0 %v2151_v50  ;;  %3147 = vmatprep.subr.bf16.mxu1 %v3296_v44 }
 0xa02   : > { %v2160_v52 = vsel %vm2150_vm0, %v2149_v51, 0.0  ;;  %v2147_v53 = vmul.f32 %v2719_v37, %v2136_v49 }
 0xa03   : > { %2161 = vadd.xlane.f32.xlu1 %v2160_v52 }
 0xa04   : > { %v2154_v54 = vsel %vm2150_vm0, %v2147_v53, 0.0  ;;  %3148 = vmatpush3.bf16.msra.mxu1 %v3296_v44 }
 0xa05   : > { %2155 = vadd.xlane.f32.xlu0 %v2154_v54  ;;  %3149 = vmatprep.subr.bf16.mxu1 %v3297_v22  ;;  %v2734_v54 = vld [vmem:[%s3898_s14] ss:$0 sm:$0xff] }
 0xa08   : > { %3150 = vmatpush3.bf16.msra.mxu1 %v3297_v22 }
 0xa09   : > { %3151 = vmatprep.subr.bf16.mxu1 %v3298_v23 }
 0xa0c   : > { %3152 = vmatpush3.bf16.msra.mxu1 %v3298_v23 }
 0xa88   : > { %v2159_v62 = vpop.xlane.xlu1 %2158 }
 0xa89   : > { %v2172_v63 = vadd.f32 %v2720_v61, %v2159_v62 }
 0xa8a   : > { %v2153_v0 = vpop.xlane.xlu0 %2152 }
 0xa8b   : > { %v2723_v1 = vmul.f32 -1.442695, %v2172_v63  ;;  %v2170_v2 = vadd.f32 %v2720_v61, %v2153_v0  ;;  %v2741_v0 = vld [vmem:[%s3899_s15] ss:$0 sm:$0xff] }
 0xa8c   : > { %v2162_v3 = vpop.xlane.xlu1 %2161 }
 0xa8d   : > { %3299 = vpow2.f32 %v2723_v1  ;;  %v2721_v4 = vmul.f32 -1.442695, %v2170_v2  ;;  %v2173_v5 = vadd.f32 %v2720_v61, %v2162_v3 }
 0xa8e   : > { %v2156_v6 = vpop.xlane.xlu0 %2155 }
 0xa8f   : > { %3301 = vpow2.f32 %v2721_v4  ;;  %v2724_v7 = vmul.f32 -1.442695, %v2173_v5  ;;  %v2171_v8 = vadd.f32 %v2720_v61, %v2156_v6 }
 0xa91   : > { %v2722_v9 = vmul.f32 -1.442695, %v2171_v8  ;;  %3303 = vpow2.f32 %v2724_v7 }
 0xa93   : > { %3305 = vpow2.f32 %v2722_v9 }
 0xa9a   : > { %v3300_v10 = vpop.eup %3299 }
 0xa9b   : > { %v2188_v11 = vadd.f32 1.0, %v3300_v10 }
 0xa9c   : > { %v3302_v12 = vpop.eup %3301 }
 0xa9d   : > { %3307 = vrcp.f32 %v2188_v11  ;;  %v2186_v13 = vadd.f32 1.0, %v3302_v12  ;;  %v2742_v12 = vld [vmem:[#allocation3] ss:$0 sm:$0xff] }
 0xa9e   : > { %v3304_v14 = vpop.eup %3303 }
 0xa9f   : > { %3309 = vrcp.f32 %v2186_v13  ;;  %v2189_v17 = vadd.f32 1.0, %v3304_v14 }
 0xaa0   : > { %v3306_v15 = vpop.eup %3305 }
 0xaa1   : > { %v2187_v16 = vadd.f32 1.0, %v3306_v15 }
 0xaa3   : > { %3311 = vrcp.f32 %v2187_v16 }
 0xaa4   : > { %3313 = vrcp.f32 %v2189_v17 }
 0xaaa   : > { %v3308_v19 = vpop.eup %3307 }
 0xaab   : > { %2210 = vperm.xlu1 %3190, %v3308_v19  }
 0xaac   : > { %v3310_v21 = vpop.eup %3309 }
 0xaad   : > { %2200 = vperm.xlu0 %3189, %v3310_v21  }
 0xab0   : > { %v3312_v31 = vpop.eup %3311 }
 0xab1   : > { %2205 = vperm.xlu1 %3190, %v3312_v31   ;;  %v3314_v32 = vpop.eup %3313 }
 0xab5   : > { %2215 = vperm.xlu1 %3190, %v3314_v32  }
 0xb26   : > { %v2211_v34 = vpop.permute.xlu1 %2210 }
 0xb27   : > { %v2220_v41 = vmul.f32 %v2211_v34, %v2011_v30 }
 0xb28   : > { %v2201_v35 = vpop.permute.xlu0 %2200 }
 0xb29   : > { %v2218_v37 = vmul.f32 %v2201_v35, %v2009_v28 }
 0xb2c   : > { %v2206_v36 = vpop.permute.xlu1 %2205 }
 0xb2d   : > { %v2219_v38 = vmul.f32 %v2206_v36, %v2010_v29 }
 0xb2f   : > { %v2238_v39 = vpack.c.bf16 %v2219_v38, %v2218_v37 }
 0xb30   : > { %v2216_v40 = vpop.permute.xlu1 %2215 }
 0xb31   : > { %v2221_v42 = vmul.f32 %v2216_v40, %v2012_v27  ;;  %3141 = vmatprep.mubr.bf16.mxu0 %v2238_v39  ;;  %v2725_v27 = vld [vmem:[%s3896_s12] ss:$0 sm:$0xff] }
 0xb33   : > { %v2239_v43 = vpack.c.bf16 %v2221_v42, %v2220_v41 }
 0xb35   : > { %3142 = vmatmul.mubr.bf16.vlgmr.msra.gmra.mxu0 %v2239_v43 }
 0xbf5   : > { %v3143_v25 = vpop.f32.mrf.mxu0 }
 0xbf6   : > { %v2338_v45 = vadd.f32 %v3143_v25, %v2725_v27 }
 0xbf7   : > { %v2329_v26 = vpop.f32.mrf.mxu0 }
 0xbf8   : > { %v2330_v29 = vadd.f32 %v2725_v27, %v2329_v26  ;;  %v2346_v51 = vmax.f32 %v2338_v45, 0.0 }
 0xbf9   : > { %v3144_v28 = vpop.f32.mrf.mxu0 }
 0xbfa   : > { %v2341_v30 = vadd.f32 %v3144_v28, %v2725_v27  ;;  %v2344_v49 = vmax.f32 %v2330_v29, 0.0 }
 0xbfb   : > { %v2332_v46 = vpop.f32.mrf.mxu0 }
 0xbfc   : > { %v2333_v47 = vadd.f32 %v2725_v27, %v2332_v46  ;;  %v2347_v48 = vmax.f32 %v2341_v30, 0.0 }
 0xbfe   : > { %v2345_v50 = vmax.f32 %v2333_v47, 0.0  ;;  %v2357_v53 = vpack.c.bf16 %v2347_v48, %v2346_v51 }
 0xc00   : > { %v2356_v52 = vpack.c.bf16 %v2345_v50, %v2344_v49 }
 0xc02   : > { %3153 = vmatprep.mubr.msk.bf16.mxu1 %vm2150_vm0, %v2356_v52 }
 0xc03   : > { %3154 = vmatmul.mubr.msk.bf16.vlgmr.msra.gmra.mxu1 %vm2150_vm0, %v2357_v53 }
 0xcc3   : > { %v3155_v55 = vpop.f32.mrf.mxu1 }
 0xcc4   : > { %v2438_v56 = vadd.f32 %v3155_v55, %v2734_v54 }
 0xcc5   : > { %v2429_v57 = vpop.f32.mrf.mxu1 }
 0xcc6   : > { %v2430_v58 = vadd.f32 %v2734_v54, %v2429_v57  ;;  %v2446_v60 = vmax.f32 %v2438_v56, 0.0 }
 0xcc7   : > { %v3156_v59 = vpop.f32.mrf.mxu1 }
 0xcc8   : > { %v2444_v61 = vmax.f32 %v2430_v58, 0.0  ;;  %v2441_v62 = vadd.f32 %v3156_v59, %v2734_v54  ;;  %v2457_v6 = vmul.f32 %v2741_v0, %v2446_v60 }
 0xcc9   : > { %v2432_v63 = vpop.f32.mrf.mxu1 }
 0xcca   : > { %v2433_v1 = vadd.f32 %v2734_v54, %v2432_v63  ;;  %v2455_v2 = vmul.f32 %v2741_v0, %v2444_v61  ;;  %v2447_v3 = vmax.f32 %v2441_v62, 0.0  ;;  %v2466_v9 = vsel %vm2459_vm1, %v2457_v6, 0.0 }
 0xccc   : > { %v2445_v4 = vmax.f32 %v2433_v1, 0.0  ;;  %v2460_v5 = vsel %vm2459_vm1, %v2455_v2, 0.0  ;;  %v2458_v10 = vmul.f32 %v2741_v0, %v2447_v3 }
 0xccd   : > { %2461 = vadd.xlane.f32.xlu1 %v2460_v5 }
 0xcce   : > { %v2456_v7 = vmul.f32 %v2741_v0, %v2445_v4  ;;  %v2469_v11 = vsel %vm2459_vm1, %v2458_v10, 0.0 }
 0xcd0   : > { %v2463_v8 = vsel %vm2459_vm1, %v2456_v7, 0.0 }
 0xcd1   : > { %2464 = vadd.xlane.f32.xlu0 %v2463_v8  ;;  %2467 = vadd.xlane.f32.xlu1 %v2466_v9 }
 0xcd5   : > { %2470 = vadd.xlane.f32.xlu1 %v2469_v11 }
 0xd56   : > { %v2462_v13 = vpop.xlane.xlu1 %2461 }
 0xd57   : > { %v2479_v14 = vadd.f32 %v2742_v12, %v2462_v13 }
 0xd59   : > { %v2743_v15 = vmul.f32 -1.442695, %v2479_v14 }
 0xd5a   : > { %v2465_v16 = vpop.xlane.xlu0 %2464  ;;  %v2468_v17 = vpop.xlane.xlu1 %2467 }
 0xd5b   : > { %3315 = vpow2.f32 %v2743_v15  ;;  %v2480_v18 = vadd.f32 %v2742_v12, %v2465_v16  ;;  %v2481_v19 = vadd.f32 %v2742_v12, %v2468_v17 }
 0xd5d   : > { %v2744_v20 = vmul.f32 -1.442695, %v2480_v18  ;;  %v2745_v21 = vmul.f32 -1.442695, %v2481_v19 }
 0xd5e   : > { %v2471_v24 = vpop.xlane.xlu1 %2470 }
 0xd5f   : > { %3317 = vpow2.f32 %v2744_v20  ;;  %v2482_v31 = vadd.f32 %v2742_v12, %v2471_v24 }
 0xd60   : > { %3319 = vpow2.f32 %v2745_v21 }
 0xd61   : > { %v2746_v32 = vmul.f32 -1.442695, %v2482_v31 }
 0xd63   : > { %3321 = vpow2.f32 %v2746_v32 }
 0xd68   : > { %v3316_v33 = vpop.eup %3315 }
 0xd69   : > { %v2495_v34 = vadd.f32 1.0, %v3316_v33 }
 0xd6b   : > { %3323 = vrcp.f32 %v2495_v34 }
 0xd6c   : > { %v3318_v35 = vpop.eup %3317 }
 0xd6d   : > { %v3320_v36 = vpop.eup %3319  ;;  %v2496_v37 = vadd.f32 1.0, %v3318_v35 }
 0xd6e   : > { %v2497_v38 = vadd.f32 1.0, %v3320_v36 }
 0xd6f   : > { %3325 = vrcp.f32 %v2496_v37 }
 0xd70   : > { %v3322_v39 = vpop.eup %3321  ;;  %3327 = vrcp.f32 %v2497_v38 }
 0xd71   : > { %v2498_v40 = vadd.f32 1.0, %v3322_v39 }
 0xd73   : > { %3329 = vrcp.f32 %v2498_v40 }
 0xd78   : > { %v3324_v41 = vpop.eup %3323 }
 0xd79   : > { %2508 = vst.msk [vmem:[%s584_s1] sm:$0xff] %vm2507_vm2, %v3324_v41 }
 0xd7c   : > { %v3326_v42 = vpop.eup %3325 }
 0xd7d   : > { %v3328_v43 = vpop.eup %3327  ;;  %2509 = vst.msk [vmem:[%s584_s1 + $0x8] sm:$0xff] %vm2507_vm2, %v3326_v42 }
 0xd7e   : > { %2510 = vst.msk [vmem:[%s584_s1 + $0x10] sm:$0xff] %vm2507_vm2, %v3328_v43 }
 0xd80   : > { %v3330_v44 = vpop.eup %3329 }
 0xd81   : > { %2511 = vst.msk [vmem:[%s584_s1 + $0x18] sm:$0xff] %vm2507_vm2, %v3330_v44 }
 0xd82 PF: > { %s33_s28 = sadd.s32 1, %s3397_s28  }
 0xd83   : > { %p30_p2 = scmp.ge.s32.totalorder %s33_s28, 4  }
 0xd85   :  { %32 = sbr.rel (!%p30_p2) target bundleno = 5 (0x5), region = 143 }
 0xd8a   :  { %2534 = vsyncpa [#allocation5], 1 }
 0xd8b   :  { %2536 = vsyncpa [#allocation5 + $0x1], 1 }
 0xd8c   :  { %2537 = vsyncpa [#allocation7], 1 }

</bundles_post_ra>
